<compile_context>
chip_gen: v5e
topology: v5e:2x2
jax: 0.10.0
libtpu: 0.0.40
codegen_flags: <defaults>
</compile_context>

<pallas_src>
import functools

import jax
import jax.numpy as jnp
from jax.experimental import pallas as pl
from jax.experimental.pallas import tpu as pltpu

IN_DIM = 28 * 28          # 784 (multiple of 8 -> legal sublane extent for w1)
HID = 512
OUT_DIM = 10
OUT_DIM_PAD = 128         # lane-dense output slab; sliced to 10 in the wrapper


def mlp_kernel(x_ref, w1_ref, b1_ref, w2_ref, b2_ref, w3_ref, b3_ref, out_ref):
    # In-kernel cast of the streamed x tile (fuses what used to be a separate
    # XLA pad/cast pass over HBM).
    x = x_ref[...].astype(jnp.bfloat16)
    # Layer 1: Linear(784->512) + ReLU   (bf16 operands, f32 MXU accumulation)
    h1 = jnp.dot(x, w1_ref[...], preferred_element_type=jnp.float32)
    h1 = jnp.maximum(h1 + b1_ref[...], 0.0).astype(jnp.bfloat16)
    # Layer 2: Linear(512->512) + ReLU
    h2 = jnp.dot(h1, w2_ref[...], preferred_element_type=jnp.float32)
    h2 = jnp.maximum(h2 + b2_ref[...], 0.0).astype(jnp.bfloat16)
    # Layer 3: Linear(512->10), padded to 128 output lanes (no activation)
    logits = jnp.dot(h2, w3_ref[...], preferred_element_type=jnp.float32)
    out_ref[...] = logits + b3_ref[...]


def prepare_params(params):
    """One-time weight/bias pad + cast (call ONCE, outside the forward path).

    Weights stored (in, out) in bf16; biases (1, out) in f32; w3/b3 padded to
    128 output lanes. Doing this per forward call re-reads ~4.7 MB of f32
    weights on every call, which dominates small-batch runtime."""
    w1, b1, w2, b2, w3, b3 = params
    return (
        w1.astype(jnp.bfloat16),                                       # (784, 512)
        b1.reshape(1, HID).astype(jnp.float32),
        w2.astype(jnp.bfloat16),                                       # (512, 512)
        b2.reshape(1, HID).astype(jnp.float32),
        jnp.pad(w3, ((0, 0), (0, OUT_DIM_PAD - OUT_DIM))).astype(jnp.bfloat16),
        jnp.pad(b3.reshape(1, OUT_DIM),
                ((0, 0), (0, OUT_DIM_PAD - OUT_DIM))).astype(jnp.float32),
    )


@functools.partial(jax.jit, static_argnames=("batch_tile",))
def neural_network_forward(x, prepared_params, *, batch_tile=512):
    """x: (B, 28, 28) or (B, 1, 28, 28), f32 or bf16. Returns logits (B, 10) f32.

    prepared_params: output of prepare_params() (pre-padded bf16 weights)."""
    w1, b1, w2, b2, w3, b3 = prepared_params
    B = x.shape[0]
    x_flat = x.reshape(B, -1)                       # nn.Flatten (row-major)
    assert x_flat.shape[1] == IN_DIM
    if x_flat.dtype != jnp.bfloat16:                # accept bf16 directly
        x_flat = x_flat.astype(jnp.float32)

    # --- batch tiling: TB rows per grid step --------------------------------
    B_sub = ((B + 7) // 8) * 8                      # sublane-align (mult. of 8)
    TB = min(batch_tile, B_sub)
    # Keep >=2 grid steps for non-trivial batches so the "parallel" batch axis
    # can shard across both TensorCores on v7x (harmless on v5e/v6e).
    if B_sub >= 256:
        TB = min(TB, ((B_sub // 2 + 7) // 8) * 8)
    B_pad = ((B_sub + TB - 1) // TB) * TB
    if B_pad != B:
        x_flat = jnp.pad(x_flat, ((0, B_pad - B), (0, 0)))
    grid = (B_pad // TB,)

    # Resident-weight specs: constant block index => DMA'd once, kept in VMEM
    # across grid steps; x/out tiles are auto double-buffered.
    # (Optional v7x knob: pipeline_mode=pl.Buffered(1) on the constant specs
    #  saves ~1.5 MiB VMEM; footprint at TB<=1024 already fits comfortably.)
    const = lambda i: (0, 0)
    in_specs = [
        pl.BlockSpec((TB, IN_DIM), lambda i: (i, 0)),   # x tile (streamed; last
                                                        # dim == full array dim)
        pl.BlockSpec((IN_DIM, HID), const),             # w1 (unpadded 784 K dim)
        pl.BlockSpec((1, HID), const),                  # b1
        pl.BlockSpec((HID, HID), const),                # w2
        pl.BlockSpec((1, HID), const),                  # b2
        pl.BlockSpec((HID, OUT_DIM_PAD), const),        # w3 (padded to 128)
        pl.BlockSpec((1, OUT_DIM_PAD), const),          # b3 (padded to 128)
    ]
    out_spec = pl.BlockSpec((TB, OUT_DIM_PAD), lambda i: (i, 0))

    flops = 2 * B_pad * (IN_DIM * HID + HID * HID + HID * OUT_DIM_PAD)
    bytes_accessed = (
        x_flat.size * x_flat.dtype.itemsize             # streamed activations
        + (w1.size + w2.size + w3.size) * 2              # bf16 resident weights
        + (b1.size + b2.size + b3.size) * 4              # f32 biases
        + B_pad * OUT_DIM_PAD * 4                        # f32 logits out
    )

    out = pl.pallas_call(
        mlp_kernel,
        out_shape=jax.ShapeDtypeStruct((B_pad, OUT_DIM_PAD), jnp.float32),
        grid=grid,
        in_specs=in_specs,
        out_specs=out_spec,
        compiler_params=pltpu.CompilerParams(
            dimension_semantics=("parallel",),
            # Explicit scoped-VMEM budget: raises v5e's 16 MiB default, covers
            # TB up to ~1024, stays within v7x's 64 MiB physical VMEM.
            vmem_limit_bytes=32 * 1024 * 1024,
        ),
        cost_estimate=pl.CostEstimate(
            flops=flops, transcendentals=0, bytes_accessed=bytes_accessed),
    )(x_flat, w1, b1, w2, b2, w3, b3)

    return out[:B, :OUT_DIM]


def init_params(key):
    """Deterministic init mimicking PyTorch's default Linear init
    (uniform(-1/sqrt(fan_in), 1/sqrt(fan_in))). Weights stored as (in, out)."""
    dims = [(IN_DIM, HID), (HID, HID), (HID, OUT_DIM)]
    params = []
    for fan_in, fan_out in dims:
        kw, kb, key = jax.random.split(key, 3)
        bound = 1.0 / (fan_in ** 0.5)
        w = jax.random.uniform(kw, (fan_in, fan_out), jnp.float32, -bound, bound)
        b = jax.random.uniform(kb, (1, fan_out), jnp.float32, -bound, bound)
        params.extend([w, b])
    return tuple(params)


def reference_forward(x, params):
    """Pure-JAX f32 reference for correctness check."""
    w1, b1, w2, b2, w3, b3 = params
    h = x.reshape(x.shape[0], -1).astype(jnp.float32)
    h = jnp.maximum(h @ w1 + b1, 0.0)
    h = jnp.maximum(h @ w2 + b2, 0.0)
    return h @ w3 + b3


if __name__ == "__main__":
    key = jax.random.PRNGKey(0)
    kx, kp = jax.random.split(key)
    params = init_params(kp)
    prepared = prepare_params(params)     # one-time weight pad/cast (hoisted)

    # Small batch of MNIST-shaped inputs.
    x = jax.random.normal(kx, (8, 28, 28), dtype=jnp.float32)

    logits = neural_network_forward(x, prepared)
    logits = jax.block_until_ready(logits)

    ref = reference_forward(x, params)
    assert logits.shape == (8, 10)
    # Tolerance loosened for bf16 activations/weights (f32 accumulation kept).
    assert jnp.allclose(logits, ref, atol=3e-2, rtol=3e-2), (
        float(jnp.max(jnp.abs(logits - ref))))

    print("KERNEL_OK")
</pallas_src>

<mosaic_0001>
module attributes {stable_mosaic.version = 11 : i64} {
  func.func @mlp_kernel(%arg0: i32, %arg1: memref<8x784xf32, #tpu.memory_space<vmem>>, %arg2: memref<784x512xbf16, #tpu.memory_space<vmem>>, %arg3: memref<1x512xf32, #tpu.memory_space<vmem>>, %arg4: memref<512x512xbf16, #tpu.memory_space<vmem>>, %arg5: memref<1x512xf32, #tpu.memory_space<vmem>>, %arg6: memref<512x128xbf16, #tpu.memory_space<vmem>>, %arg7: memref<1x128xf32, #tpu.memory_space<vmem>>, %arg8: memref<8x128xf32, #tpu.memory_space<vmem>>) attributes {dimension_semantics = [#tpu.dimension_semantics<parallel>], iteration_bounds = array<i64: 1>, scalar_prefetch = 0 : i64, scratch_operands = 0 : i64, tpu.core_type = #tpu.core_type<tc>, window_params = [{transform_indices = @transform_0, window_bounds = array<i64: 8, 784>}, {pipeline_mode = #tpu.pipeline_mode<synchronous>, transform_indices = @transform_1, window_bounds = array<i64: 784, 512>}, {pipeline_mode = #tpu.pipeline_mode<synchronous>, transform_indices = @transform_2, window_bounds = array<i64: 1, 512>}, {pipeline_mode = #tpu.pipeline_mode<synchronous>, transform_indices = @transform_3, window_bounds = array<i64: 512, 512>}, {pipeline_mode = #tpu.pipeline_mode<synchronous>, transform_indices = @transform_4, window_bounds = array<i64: 1, 512>}, {pipeline_mode = #tpu.pipeline_mode<synchronous>, transform_indices = @transform_5, window_bounds = array<i64: 512, 128>}, {pipeline_mode = #tpu.pipeline_mode<synchronous>, transform_indices = @transform_6, window_bounds = array<i64: 1, 128>}, {transform_indices = @transform_7, window_bounds = array<i64: 8, 128>}]} {
    %c0 = arith.constant 0 : index
    %c0_0 = arith.constant 0 : index
    %0 = vector.load %arg1[%c0, %c0_0] : memref<8x784xf32, #tpu.memory_space<vmem>>, vector<8x784xf32>
    %1 = arith.truncf %0 : vector<8x784xf32> to vector<8x784xbf16>
    %c0_1 = arith.constant 0 : index
    %c0_2 = arith.constant 0 : index
    %2 = vector.load %arg2[%c0_1, %c0_2] : memref<784x512xbf16, #tpu.memory_space<vmem>>, vector<784x512xbf16>
    %cst = arith.constant dense<0.000000e+00> : vector<8x512xf32>
    %3 = tpu.matmul %1, %2, %cst {dimension_numbers = #tpu.dot_dimension_numbers<[1], [0], [0], [1], [0, 0, 1, 1], [], []>} : vector<8x784xbf16>, vector<784x512xbf16>, vector<8x512xf32> -> vector<8x512xf32>
    %c0_3 = arith.constant 0 : index
    %c0_4 = arith.constant 0 : index
    %4 = vector.load %arg3[%c0_3, %c0_4] : memref<1x512xf32, #tpu.memory_space<vmem>>, vector<1x512xf32>
    %5 = vector.broadcast %4 : vector<1x512xf32> to vector<8x512xf32>
    %6 = arith.addf %3, %5 : vector<8x512xf32>
    %cst_5 = arith.constant 0.000000e+00 : f32
    %7 = vector.broadcast %cst_5 : f32 to vector<8x512xf32>
    %8 = arith.maximumf %6, %7 : vector<8x512xf32>
    %9 = arith.truncf %8 : vector<8x512xf32> to vector<8x512xbf16>
    %c0_6 = arith.constant 0 : index
    %c0_7 = arith.constant 0 : index
    %10 = vector.load %arg4[%c0_6, %c0_7] : memref<512x512xbf16, #tpu.memory_space<vmem>>, vector<512x512xbf16>
    %cst_8 = arith.constant dense<0.000000e+00> : vector<8x512xf32>
    %11 = tpu.matmul %9, %10, %cst_8 {dimension_numbers = #tpu.dot_dimension_numbers<[1], [0], [0], [1], [0, 0, 1, 1], [], []>} : vector<8x512xbf16>, vector<512x512xbf16>, vector<8x512xf32> -> vector<8x512xf32>
    %c0_9 = arith.constant 0 : index
    %c0_10 = arith.constant 0 : index
    %12 = vector.load %arg5[%c0_9, %c0_10] : memref<1x512xf32, #tpu.memory_space<vmem>>, vector<1x512xf32>
    %13 = vector.broadcast %12 : vector<1x512xf32> to vector<8x512xf32>
    %14 = arith.addf %11, %13 : vector<8x512xf32>
    %cst_11 = arith.constant 0.000000e+00 : f32
    %15 = vector.broadcast %cst_11 : f32 to vector<8x512xf32>
    %16 = arith.maximumf %14, %15 : vector<8x512xf32>
    %17 = arith.truncf %16 : vector<8x512xf32> to vector<8x512xbf16>
    %c0_12 = arith.constant 0 : index
    %c0_13 = arith.constant 0 : index
    %18 = vector.load %arg6[%c0_12, %c0_13] : memref<512x128xbf16, #tpu.memory_space<vmem>>, vector<512x128xbf16>
    %cst_14 = arith.constant dense<0.000000e+00> : vector<8x128xf32>
    %19 = tpu.matmul %17, %18, %cst_14 {dimension_numbers = #tpu.dot_dimension_numbers<[1], [0], [0], [1], [0, 0, 1, 1], [], []>} : vector<8x512xbf16>, vector<512x128xbf16>, vector<8x128xf32> -> vector<8x128xf32>
    %c0_15 = arith.constant 0 : index
    %c0_16 = arith.constant 0 : index
    %20 = vector.load %arg7[%c0_15, %c0_16] : memref<1x128xf32, #tpu.memory_space<vmem>>, vector<1x128xf32>
    %21 = vector.broadcast %20 : vector<1x128xf32> to vector<8x128xf32>
    %22 = arith.addf %19, %21 : vector<8x128xf32>
    %c0_17 = arith.constant 0 : index
    %c0_18 = arith.constant 0 : index
    %23 = vector.load %arg8[%c0_17, %c0_18] : memref<8x128xf32, #tpu.memory_space<vmem>>, vector<8x128xf32>
    tpu.vector_store %arg8[%c0_17, %c0_18], %22 {strides = array<i32>} : memref<8x128xf32, #tpu.memory_space<vmem>>, vector<8x128xf32>,
    return
  }
  func.func @transform_0(%arg0: i32) -> (i32, i32) {
    %c0_i32 = arith.constant 0 : i32
    %c0_i32_0 = arith.constant 0 : i32
    return %arg0, %c0_i32 : i32, i32
  }
  func.func @transform_1(%arg0: i32) -> (i32, i32) {
    %c0_i32 = arith.constant 0 : i32
    %c0_i32_0 = arith.constant 0 : i32
    %c0_i32_1 = arith.constant 0 : i32
    return %c0_i32, %c0_i32_0 : i32, i32
  }
  func.func @transform_2(%arg0: i32) -> (i32, i32) {
    %c0_i32 = arith.constant 0 : i32
    %c0_i32_0 = arith.constant 0 : i32
    %c0_i32_1 = arith.constant 0 : i32
    return %c0_i32, %c0_i32_0 : i32, i32
  }
  func.func @transform_3(%arg0: i32) -> (i32, i32) {
    %c0_i32 = arith.constant 0 : i32
    %c0_i32_0 = arith.constant 0 : i32
    %c0_i32_1 = arith.constant 0 : i32
    return %c0_i32, %c0_i32_0 : i32, i32
  }
  func.func @transform_4(%arg0: i32) -> (i32, i32) {
    %c0_i32 = arith.constant 0 : i32
    %c0_i32_0 = arith.constant 0 : i32
    %c0_i32_1 = arith.constant 0 : i32
    return %c0_i32, %c0_i32_0 : i32, i32
  }
  func.func @transform_5(%arg0: i32) -> (i32, i32) {
    %c0_i32 = arith.constant 0 : i32
    %c0_i32_0 = arith.constant 0 : i32
    %c0_i32_1 = arith.constant 0 : i32
    return %c0_i32, %c0_i32_0 : i32, i32
  }
  func.func @transform_6(%arg0: i32) -> (i32, i32) {
    %c0_i32 = arith.constant 0 : i32
    %c0_i32_0 = arith.constant 0 : i32
    %c0_i32_1 = arith.constant 0 : i32
    return %c0_i32, %c0_i32_0 : i32, i32
  }
  func.func @transform_7(%arg0: i32) -> (i32, i32) {
    %c0_i32 = arith.constant 0 : i32
    %c0_i32_0 = arith.constant 0 : i32
    return %arg0, %c0_i32 : i32, i32
  }
}

</mosaic_0001>

<bundles_post_ra>
// kernel: neural_network_forward.1
= control target key start
LH: loop header
LB: loop body
LE: loop exit
PB: predicated region body
PF: predicated region fallthrough
CT: control target
= control target key end

     0   :  { %12 = vsyncpa [#allocation3], 0  ;;  %s5142_s0 = inlined_call_operand.vmem [shape: f32[8,784], index: 0, kind: input, shape index: {}]   ;;  %s5143_s1 = inlined_call_operand.hbm [shape: bf16[784,512], index: 1, kind: input, shape index: {}]   ;;  %s5144_s2 = inlined_call_operand.vmem [shape: f32[1,512], index: 2, kind: input, shape index: {}]   ;;  %s5145_s3 = inlined_call_operand.hbm [shape: bf16[512,512], index: 3, kind: input, shape index: {}]   ;;  %s5146_s4 = inlined_call_operand.vmem [shape: f32[1,512], index: 4, kind: input, shape index: {}]   ;;  %s5147_s5 = inlined_call_operand.vmem [shape: bf16[512,128], index: 5, kind: input, shape index: {}]   ;;  %s5148_s6 = inlined_call_operand.vmem [shape: f32[1,128], index: 6, kind: input, shape index: {}]   ;;  %s5149_s7 = inlined_call_operand.hbm [shape: f32[8,128], index: 7, kind: output, shape index: {}]  }
   0x1   :  { %13 = vsyncpa [#allocation6], 0 }
   0x2   :  { %14 = vsyncpa [#allocation4], 0  ;;  %s21_s26 = sshll.u32 %s5143_s1, 4  ;;  %s4829_s27 = smov [#allocation2]   ;;  %s22_s26 = int_to_ptr.hbm [resolvable:$true] %s21_s26 }
   0x3   :  { %s23_s28 = sshll.u32 %s4829_s27, 4  ;;  %s36_s8 = sshll.u32 %s5145_s3, 4  ;;  %s24_s28 = int_to_ptr.vmem [resolvable:$true] %s23_s28  ;;  %s37_s8 = int_to_ptr.hbm [resolvable:$true] %s36_s8 }
   0x4   :  { %s4830_s9 = smov 256   ;;  %s4831_s10 = smov 16  }
   0x5   :  { %29 = dma.hbm_to_vmem [thread:$0]  %s22_s26, 25088, %s24_s28, [#allocation3], %s4830_s9, %s4830_s9, %s4831_s10  }
   0x6   :  { %s4832_s11 = smov [#allocation5]  }
   0x7   :  { %s38_s12 = sshll.u32 %s4832_s11, 4  ;;  %s39_s12 = int_to_ptr.vmem [resolvable:$true] %s38_s12 }
   0x8   :  { %44 = dma.hbm_to_vmem [thread:$0]  %s37_s8, 16384, %s39_s12, [#allocation6], %s4830_s9, %s4830_s9, %s4831_s10  }
   0x9   :  { %4823 = dma.done.wait [#allocation3], 25088  }
   0xa   :  { %4824 = vsyncadd [#allocation3], 4294942208 }
   0xb   :  { %4825 = dma.done.wait [#allocation6], 16384  }
   0xc   :  { %4826 = vsyncadd [#allocation6], 4294950912  ;;  %v3075_v0 = vld [vmem:[#allocation2 + $0xe0] sm:$0xf]  ;;  %v4419_v1 = vld [vmem:[#allocation2 + $0xec] sm:$0xf0] }
   0xd   :  { %v3203_v2 = vld [vmem:[#allocation2 + $0x1e0] sm:$0xf]  ;;  %v3076_v3 = vor.u32 %v4419_v1, %v3075_v0  ;;  %v4451_v4 = vld [vmem:[#allocation2 + $0x1ec] sm:$0xf0]  ;;  %vm1260_vm0 = vcmask 130048   ;;  %s4833_s12 = smov [#allocation7]  }
   0xe   :  { %v3331_v5 = vld [vmem:[#allocation2 + $0x2e0] sm:$0xf]  ;;  %v4483_v6 = vld [vmem:[#allocation2 + $0x2ec] sm:$0xf0]  ;;  %v3204_v7 = vor.u32 %v4451_v4, %v3203_v2  ;;  %s2948_s1 = sshll.u32 %s4833_s12, 4  ;;  %s2950_s14 = sshll.u32 %s5149_s7, 4  ;;  %s2949_s1 = int_to_ptr.vmem [resolvable:$true] %s2948_s1  ;;  %s2951_s14 = int_to_ptr.hbm [resolvable:$true] %s2950_s14 }
   0xf   :  { %v3332_v8 = vor.u32 %v4483_v6, %v3331_v5  ;;  %v3459_v9 = vld [vmem:[#allocation2 + $0x3e0] sm:$0xf]  ;;  %v4515_v10 = vld [vmem:[#allocation2 + $0x3ec] sm:$0xf0]  ;;  %1264 = vmatpush.bf16.msra.mxu0 %v3076_v3 }
  0x10   :  { %v3059_v11 = vld [vmem:[#allocation2 + $0xc0] sm:$0xf]  ;;  %v3460_v12 = vor.u32 %v4515_v10, %v3459_v9  ;;  %v4415_v13 = vld [vmem:[#allocation2 + $0xcc] sm:$0xf0]  ;;  %1277 = vmatpush.bf16.msra.mxu1 %v3204_v7 }
  0x11   :  { %v3187_v14 = vld [vmem:[#allocation2 + $0x1c0] sm:$0xf]  ;;  %v4447_v15 = vld [vmem:[#allocation2 + $0x1cc] sm:$0xf0]  ;;  %1290 = vmatpush.bf16.msra.mxu2 %v3332_v8  ;;  %v3060_v16 = vor.u32 %v4415_v13, %v3059_v11 }
  0x12   :  { %v3188_v17 = vor.u32 %v4447_v15, %v3187_v14  ;;  %v3315_v18 = vld [vmem:[#allocation2 + $0x2c0] sm:$0xf]  ;;  %v4479_v19 = vld [vmem:[#allocation2 + $0x2cc] sm:$0xf0]  ;;  %1303 = vmatpush.bf16.msra.mxu3 %v3460_v12 }
  0x13   :  { %v3443_v20 = vld [vmem:[#allocation2 + $0x3c0] sm:$0xf]  ;;  %v3316_v21 = vor.u32 %v4479_v19, %v3315_v18  ;;  %v4511_v22 = vld [vmem:[#allocation2 + $0x3cc] sm:$0xf0]  ;;  %1265 = vmatpush.bf16.msra.mxu0 %v3060_v16 }
  0x14   :  { %v3043_v23 = vld [vmem:[#allocation2 + $0xa0] sm:$0xf]  ;;  %v4411_v24 = vld [vmem:[#allocation2 + $0xac] sm:$0xf0]  ;;  %v3444_v25 = vor.u32 %v4511_v22, %v3443_v20  ;;  %1278 = vmatpush.bf16.msra.mxu1 %v3188_v17 }
  0x15   :  { %v3171_v26 = vld [vmem:[#allocation2 + $0x1a0] sm:$0xf]  ;;  %v4443_v27 = vld [vmem:[#allocation2 + $0x1ac] sm:$0xf0]  ;;  %v3044_v29 = vor.u32 %v4411_v24, %v3043_v23  ;;  %1291 = vmatpush.bf16.msra.mxu2 %v3316_v21 }
  0x16   :  { %v3299_v28 = vld [vmem:[#allocation2 + $0x2a0] sm:$0xf]  ;;  %v4475_v30 = vld [vmem:[#allocation2 + $0x2ac] sm:$0xf0]  ;;  %v3172_v33 = vor.u32 %v4443_v27, %v3171_v26  ;;  %1304 = vmatpush.bf16.msra.mxu3 %v3444_v25 }
  0x17   :  { %v3427_v31 = vld [vmem:[#allocation2 + $0x3a0] sm:$0xf]  ;;  %v4507_v32 = vld [vmem:[#allocation2 + $0x3ac] sm:$0xf0]  ;;  %v3300_v34 = vor.u32 %v4475_v30, %v3299_v28  ;;  %1266 = vmatpush.bf16.msra.mxu0 %v3044_v29 }
  0x18   :  { %v3027_v35 = vld [vmem:[#allocation2 + $0x80] sm:$0xf]  ;;  %v4407_v36 = vld [vmem:[#allocation2 + $0x8c] sm:$0xf0]  ;;  %v3428_v38 = vor.u32 %v4507_v32, %v3427_v31  ;;  %1279 = vmatpush.bf16.msra.mxu1 %v3172_v33  ;;  %v4417_v33 = vld [vmem:[#allocation2 + $0xe4] sm:$0xf] }
  0x19   :  { %v3155_v37 = vld [vmem:[#allocation2 + $0x180] sm:$0xf]  ;;  %v4439_v39 = vld [vmem:[#allocation2 + $0x18c] sm:$0xf0]  ;;  %v3028_v44 = vor.u32 %v4407_v36, %v3027_v35  ;;  %1292 = vmatpush.bf16.msra.mxu2 %v3300_v34  ;;  %v3077_v34 = vld [vmem:[#allocation2 + $0xf0] sm:$0xf0] }
  0x1a   :  { %v3283_v40 = vld [vmem:[#allocation2 + $0x280] sm:$0xf]  ;;  %v4471_v41 = vld [vmem:[#allocation2 + $0x28c] sm:$0xf0]  ;;  %v3156_v45 = vor.u32 %v4439_v39, %v3155_v37  ;;  %1305 = vmatpush.bf16.msra.mxu3 %v3428_v38 }
  0x1b   :  { %v3411_v42 = vld [vmem:[#allocation2 + $0x380] sm:$0xf]  ;;  %v4503_v43 = vld [vmem:[#allocation2 + $0x38c] sm:$0xf0]  ;;  %v3284_v46 = vor.u32 %v4471_v41, %v3283_v40  ;;  %1267 = vmatpush.bf16.msra.mxu0 %v3028_v44  ;;  %v3205_v44 = vld [vmem:[#allocation2 + $0x1f0] sm:$0xf0] }
  0x1c   :  { %v3011_v47 = vld [vmem:[#allocation2 + $0x60] sm:$0xf]  ;;  %v4403_v48 = vld [vmem:[#allocation2 + $0x6c] sm:$0xf0]  ;;  %v3412_v50 = vor.u32 %v4503_v43, %v3411_v42  ;;  %1280 = vmatpush.bf16.msra.mxu1 %v3156_v45  ;;  %v4449_v43 = vld [vmem:[#allocation2 + $0x1e4] sm:$0xf] }
  0x1d   :  { %v3139_v49 = vld [vmem:[#allocation2 + $0x160] sm:$0xf]  ;;  %v4435_v51 = vld [vmem:[#allocation2 + $0x16c] sm:$0xf0]  ;;  %v3012_v56 = vor.u32 %v4403_v48, %v3011_v47  ;;  %1293 = vmatpush.bf16.msra.mxu2 %v3284_v46  ;;  %v63_v45 = vld [vmem:[%s5142_s0 + $0x18] sm:$0xff]  ;;  %v3080_v47 = vor.u32 %v4417_v33, %v3077_v34 }
  0x1e   :  { %v3267_v52 = vld [vmem:[#allocation2 + $0x260] sm:$0xf]  ;;  %v4467_v53 = vld [vmem:[#allocation2 + $0x26c] sm:$0xf0]  ;;  %v3140_v57 = vor.u32 %v4435_v51, %v3139_v49  ;;  %1306 = vmatpush.bf16.msra.mxu3 %v3412_v50 }
  0x1f   :  { %v3395_v54 = vld [vmem:[#allocation2 + $0x360] sm:$0xf]  ;;  %v4499_v55 = vld [vmem:[#allocation2 + $0x36c] sm:$0xf0]  ;;  %v3268_v58 = vor.u32 %v4467_v53, %v3267_v52  ;;  %1268 = vmatpush.bf16.msra.mxu0 %v3012_v56  ;;  %v4413_v53 = vld [vmem:[#allocation2 + $0xc4] sm:$0xf] }
  0x20   :  { %v2995_v59 = vld [vmem:[#allocation2 + $0x40] sm:$0xf]  ;;  %v4399_v60 = vld [vmem:[#allocation2 + $0x4c] sm:$0xf0]  ;;  %v3396_v62 = vor.u32 %v4499_v55, %v3395_v54  ;;  %1281 = vmatpush.bf16.msra.mxu1 %v3140_v57  ;;  %v3061_v54 = vld [vmem:[#allocation2 + $0xd0] sm:$0xf0]  ;;  %v4893_v57 = vpack.c.bf16 %v63_v45, %v63_v45 }
  0x21   :  { %v3123_v61 = vld [vmem:[#allocation2 + $0x140] sm:$0xf]  ;;  %v4431_v63 = vld [vmem:[#allocation2 + $0x14c] sm:$0xf0]  ;;  %v2996_v4 = vor.u32 %v4399_v60, %v2995_v59  ;;  %1294 = vmatpush.bf16.msra.mxu2 %v3268_v58  ;;  %v61_v58 = vld [vmem:[%s5142_s0 + $0x8] sm:$0xff]  ;;  %v3208_v59 = vor.u32 %v4449_v43, %v3205_v44 }
  0x22   :  { %v3251_v0 = vld [vmem:[#allocation2 + $0x240] sm:$0xf]  ;;  %v4463_v1 = vld [vmem:[#allocation2 + $0x24c] sm:$0xf0]  ;;  %v3124_v5 = vor.u32 %v4431_v63, %v3123_v61  ;;  %1307 = vmatpush.bf16.msra.mxu3 %v3396_v62  ;;  %v4445_v61 = vld [vmem:[#allocation2 + $0x1c4] sm:$0xf] }
  0x23   :  { %v3379_v2 = vld [vmem:[#allocation2 + $0x340] sm:$0xf]  ;;  %v4495_v3 = vld [vmem:[#allocation2 + $0x34c] sm:$0xf0]  ;;  %v3252_v6 = vor.u32 %v4463_v1, %v3251_v0  ;;  %1269 = vmatpush.bf16.msra.mxu0 %v2996_v4  ;;  %v3189_v62 = vld [vmem:[#allocation2 + $0x1d0] sm:$0xf0]  ;;  %v3064_v0 = vor.u32 %v4413_v53, %v3061_v54 }
  0x24   :  { %v2979_v7 = vld [vmem:[#allocation2 + $0x20] sm:$0xf]  ;;  %v4395_v8 = vld [vmem:[#allocation2 + $0x2c] sm:$0xf0]  ;;  %v3380_v10 = vor.u32 %v4495_v3, %v3379_v2  ;;  %1282 = vmatpush.bf16.msra.mxu1 %v3124_v5  ;;  %v4409_v5 = vld [vmem:[#allocation2 + $0xa4] sm:$0xf] }
  0x25   :  { %v3107_v9 = vld [vmem:[#allocation2 + $0x120] sm:$0xf]  ;;  %v4427_v11 = vld [vmem:[#allocation2 + $0x12c] sm:$0xf0]  ;;  %v2980_v16 = vor.u32 %v4395_v8, %v2979_v7  ;;  %1295 = vmatpush.bf16.msra.mxu2 %v3252_v6  ;;  %v3045_v6 = vld [vmem:[#allocation2 + $0xb0] sm:$0xf0]  ;;  %v4900_v7 = vpack.c.bf16 %v61_v58, %v61_v58  ;;  %v3192_v8 = vor.u32 %v4445_v61, %v3189_v62 }
  0x26   :  { %v3235_v12 = vld [vmem:[#allocation2 + $0x220] sm:$0xf]  ;;  %v4459_v13 = vld [vmem:[#allocation2 + $0x22c] sm:$0xf0]  ;;  %v3108_v20 = vor.u32 %v4427_v11, %v3107_v9  ;;  %1308 = vmatpush.bf16.msra.mxu3 %v3380_v10  ;;  %v4441_v10 = vld [vmem:[#allocation2 + $0x1a4] sm:$0xf] }
  0x27   :  { %v3363_v14 = vld [vmem:[#allocation2 + $0x320] sm:$0xf]  ;;  %v4491_v15 = vld [vmem:[#allocation2 + $0x32c] sm:$0xf0]  ;;  %v3236_v21 = vor.u32 %v4459_v13, %v3235_v12  ;;  %1270 = vmatpush.bf16.msra.mxu0 %v2980_v16  ;;  %v3173_v11 = vld [vmem:[#allocation2 + $0x1b0] sm:$0xf0]  ;;  %v3048_v13 = vor.u32 %v4409_v5, %v3045_v6 }
  0x28   :  { %v2963_v17 = vld [vmem:[#allocation2] sm:$0xf]  ;;  %v4391_v18 = vld [vmem:[#allocation2 + $0xc] sm:$0xf0]  ;;  %v3364_v25 = vor.u32 %v4491_v15, %v3363_v14  ;;  %1283 = vmatpush.bf16.msra.mxu1 %v3108_v20  ;;  %v3176_v20 = vor.u32 %v4441_v10, %v3173_v11  ;;  %v4397_v43 = vld [vmem:[#allocation2 + $0x44] sm:$0xf] }
  0x29   :  { %v3091_v19 = vld [vmem:[#allocation2 + $0x100] sm:$0xf]  ;;  %v4423_v22 = vld [vmem:[#allocation2 + $0x10c] sm:$0xf0]  ;;  %v2964_v32 = vor.u32 %v4391_v18, %v2963_v17  ;;  %1296 = vmatpush.bf16.msra.mxu2 %v3236_v21  ;;  %v4405_v18 = vld [vmem:[#allocation2 + $0x84] sm:$0xf] }
  0x2a   :  { %v3219_v23 = vld [vmem:[#allocation2 + $0x200] sm:$0xf]  ;;  %v4455_v24 = vld [vmem:[#allocation2 + $0x20c] sm:$0xf0]  ;;  %v3092_v36 = vor.u32 %v4423_v22, %v3091_v19  ;;  %1309 = vmatpush.bf16.msra.mxu3 %v3364_v25  ;;  %v3029_v19 = vld [vmem:[#allocation2 + $0x90] sm:$0xf0] }
  0x2b   :  { %v3347_v26 = vld [vmem:[#allocation2 + $0x300] sm:$0xf]  ;;  %v4487_v27 = vld [vmem:[#allocation2 + $0x30c] sm:$0xf0]  ;;  %v3220_v37 = vor.u32 %v4455_v24, %v3219_v23  ;;  %1271 = vmatpush.bf16.msra.mxu0 %v2964_v32  ;;  %v4437_v22 = vld [vmem:[#allocation2 + $0x184] sm:$0xf]  ;;  %v3032_v25 = vor.u32 %v4405_v18, %v3029_v19 }
  0x2c   :  { %v3587_v28 = vld [vmem:[#allocation2 + $0x4e0] sm:$0xf]  ;;  %v4547_v29 = vld [vmem:[#allocation2 + $0x4ec] sm:$0xf0]  ;;  %v3348_v41 = vor.u32 %v4487_v27, %v3347_v26  ;;  %1284 = vmatpush.bf16.msra.mxu1 %v3092_v36  ;;  %v3157_v23 = vld [vmem:[#allocation2 + $0x190] sm:$0xf0] }
  0x2d   :  { %v3715_v30 = vld [vmem:[#allocation2 + $0x5e0] sm:$0xf]  ;;  %v4579_v31 = vld [vmem:[#allocation2 + $0x5ec] sm:$0xf0]  ;;  %v3588_v42 = vor.u32 %v4547_v29, %v3587_v28  ;;  %1297 = vmatpush.bf16.msra.mxu2 %v3220_v37  ;;  %v3160_v33 = vor.u32 %v4437_v22, %v3157_v23  ;;  %v3141_v36 = vld [vmem:[#allocation2 + $0x170] sm:$0xf0] }
  0x2e   :  { %v62_v35 = vld [vmem:[%s5142_s0 + $0x10] sm:$0xff]  ;;  %v3731_v38 = vld [vmem:[#allocation2 + $0x600] sm:$0xf]  ;;  %v3716_v46 = vor.u32 %v4579_v31, %v3715_v30  ;;  %1310 = vmatpush.bf16.msra.mxu3 %v3348_v41  ;;  %v4401_v30 = vld [vmem:[#allocation2 + $0x64] sm:$0xf] }
  0x2f   :  { %v4583_v39 = vld [vmem:[#allocation2 + $0x60c] sm:$0xf0]  ;;  %v60_v40 = vld [vmem:[%s5142_s0] sm:$0xff]  ;;  %v4889_v51 = vpack.c.bf16 %v62_v35, %v62_v35  ;;  %1316 = vmatpush.bf16.msrb.mxu0 %v3588_v42  ;;  %1285 = vmatmul.bf16.vlgmr.msra.gmra.mxu1 %v4900_v7  ;;  %v3013_v31 = vld [vmem:[#allocation2 + $0x70] sm:$0xf0] }
  0x30   :  { %v3571_v48 = vld [vmem:[#allocation2 + $0x4c0] sm:$0xf]  ;;  %v4543_v49 = vld [vmem:[#allocation2 + $0x4cc] sm:$0xf0]  ;;  %v4891_v55 = vpack.c.bf16 %v60_v40, %v60_v40  ;;  %v3732_v56 = vor.u32 %v4583_v39, %v3731_v38  ;;  %1329 = vmatpush.bf16.msrb.mxu1 %v3716_v46  ;;  %v4433_v35 = vld [vmem:[#allocation2 + $0x164] sm:$0xf]  ;;  %v3016_v38 = vor.u32 %v4401_v30, %v3013_v31 }
  0x31   :  { %v3699_v50 = vld [vmem:[#allocation2 + $0x5c0] sm:$0xf]  ;;  %v4575_v52 = vld [vmem:[#allocation2 + $0x5cc] sm:$0xf0]  ;;  %v3572_v60 = vor.u32 %v4543_v49, %v3571_v48  ;;  %1298 = vmatmul.bf16.vlgmr.msra.gmra.mxu2 %v4889_v51  ;;  %1311 = vmatmul.bf16.vlgmr.msra.gmra.mxu3 %v4893_v57  ;;  %v2997_v44 = vld [vmem:[#allocation2 + $0x50] sm:$0xf0]  ;;  %v3144_v46 = vor.u32 %v4433_v35, %v3141_v36 }
  0x32   :  { %1355 = vmatpush.bf16.msrb.mxu3 %v3080_v47  ;;  %v3700_v63 = vor.u32 %v4575_v52, %v3699_v50  ;;  %v3555_v1 = vld [vmem:[#allocation2 + $0x4a0] sm:$0xf]  ;;  %v4539_v2 = vld [vmem:[#allocation2 + $0x4ac] sm:$0xf0]  ;;  %1272 = vmatmul.bf16.vlgmr.msra.gmra.mxu0 %v4891_v55  ;;  %v4429_v48 = vld [vmem:[#allocation2 + $0x144] sm:$0xf]  ;;  %v3000_v52 = vor.u32 %v4397_v43, %v2997_v44 }
  0x33   :  { %v3683_v3 = vld [vmem:[#allocation2 + $0x5a0] sm:$0xf]  ;;  %v4571_v4 = vld [vmem:[#allocation2 + $0x5ac] sm:$0xf0]  ;;  %1349 = vmatpush.bf16.msrb.mxu2 %v3732_v56  ;;  %1317 = vmatpush.bf16.msrb.mxu0 %v3572_v60  ;;  %v3556_v9 = vor.u32 %v4539_v2, %v3555_v1  ;;  %v3125_v49 = vld [vmem:[#allocation2 + $0x150] sm:$0xf0] }
  0x34   :  { %1330 = vmatpush.bf16.msrb.mxu1 %v3700_v63  ;;  %v3684_v12 = vor.u32 %v4571_v4, %v3683_v3  ;;  %v3539_v14 = vld [vmem:[#allocation2 + $0x480] sm:$0xf]  ;;  %v4535_v15 = vld [vmem:[#allocation2 + $0x48c] sm:$0xf0]  ;;  %v2981_v60 = vld [vmem:[#allocation2 + $0x30] sm:$0xf0]  ;;  %v3128_v61 = vor.u32 %v4429_v48, %v3125_v49 }
  0x35   :  { %v3667_v16 = vld [vmem:[#allocation2 + $0x580] sm:$0xf]  ;;  %v4567_v17 = vld [vmem:[#allocation2 + $0x58c] sm:$0xf0]  ;;  %v3540_v21 = vor.u32 %v4535_v15, %v3539_v14  ;;  %v4425_v63 = vld [vmem:[#allocation2 + $0x124] sm:$0xf] }
  0x36   :  { %1356 = vmatpush.bf16.msrb.mxu3 %v3064_v0  ;;  %v3668_v24 = vor.u32 %v4567_v17, %v3667_v16  ;;  %v3523_v26 = vld [vmem:[#allocation2 + $0x460] sm:$0xf]  ;;  %v4531_v27 = vld [vmem:[#allocation2 + $0x46c] sm:$0xf0]  ;;  %v3109_v0 = vld [vmem:[#allocation2 + $0x130] sm:$0xf0] }
  0x37   :  { %1368 = vmatpush.bf16.msra.mxu2 %v3208_v59  ;;  %1318 = vmatpush.bf16.msrb.mxu0 %v3556_v9  ;;  %v3651_v28 = vld [vmem:[#allocation2 + $0x560] sm:$0xf]  ;;  %v4563_v29 = vld [vmem:[#allocation2 + $0x56c] sm:$0xf0]  ;;  %v3524_v34 = vor.u32 %v4531_v27, %v3523_v26  ;;  %v4393_v59 = vld [vmem:[#allocation2 + $0x24] sm:$0xf]  ;;  %v3112_v14 = vor.u32 %v4425_v63, %v3109_v0 }
  0x38   :  { %1331 = vmatpush.bf16.msrb.mxu1 %v3684_v12  ;;  %v66_v32 = vld [vmem:[%s5142_s0 + $0x30] sm:$0xff]  ;;  %v3652_v37 = vor.u32 %v4563_v29, %v3651_v28  ;;  %v3507_v39 = vld [vmem:[#allocation2 + $0x440] sm:$0xf]  ;;  %v2984_v3 = vor.u32 %v4393_v59, %v2981_v60  ;;  %v4481_v10 = vld [vmem:[#allocation2 + $0x2e4] sm:$0xf] }
  0x39   :  { %v4527_v40 = vld [vmem:[#allocation2 + $0x44c] sm:$0xf0]  ;;  %v3635_v41 = vld [vmem:[#allocation2 + $0x540] sm:$0xf]  ;;  %v4907_v45 = vpack.c.bf16 %v66_v32, %v66_v32  ;;  %v2965_v9 = vld [vmem:[#allocation2 + $0x10] sm:$0xf0] }
  0x3a   :  { %1357 = vmatpush.bf16.msrb.mxu3 %v3048_v13  ;;  %v4559_v42 = vld [vmem:[#allocation2 + $0x54c] sm:$0xf0]  ;;  %v3508_v47 = vor.u32 %v4527_v40, %v3507_v39  ;;  %v3491_v53 = vld [vmem:[#allocation2 + $0x420] sm:$0xf]  ;;  %v3333_v11 = vld [vmem:[#allocation2 + $0x2f0] sm:$0xf0] }
  0x3b   :  { %1369 = vmatpush.bf16.msra.mxu2 %v3192_v8  ;;  %1319 = vmatpush.bf16.msrb.mxu0 %v3540_v21  ;;  %v3636_v50 = vor.u32 %v4559_v42, %v3635_v41  ;;  %v4523_v54 = vld [vmem:[#allocation2 + $0x42c] sm:$0xf0]  ;;  %v3619_v56 = vld [vmem:[#allocation2 + $0x520] sm:$0xf]  ;;  %v4389_v8 = vld [vmem:[#allocation2 + $0x4] sm:$0xf] }
  0x3c   :  { %1332 = vmatpush.bf16.msrb.mxu1 %v3668_v24  ;;  %v4555_v58 = vld [vmem:[#allocation2 + $0x52c] sm:$0xf0]  ;;  %v3492_v62 = vor.u32 %v4523_v54, %v3491_v53  ;;  %v3475_v1 = vld [vmem:[#allocation2 + $0x400] sm:$0xf]  ;;  %v4513_v12 = vld [vmem:[#allocation2 + $0x3e4] sm:$0xf]  ;;  %v3336_v24 = vor.u32 %v4481_v10, %v3333_v11 }
  0x3d   :  { %v3620_v2 = vor.u32 %v4555_v58, %v3619_v56  ;;  %v4519_v4 = vld [vmem:[#allocation2 + $0x40c] sm:$0xf0]  ;;  %v3603_v5 = vld [vmem:[#allocation2 + $0x500] sm:$0xf]  ;;  %v3461_v13 = vld [vmem:[#allocation2 + $0x3f0] sm:$0xf0] }
  0x3e   :  { %1358 = vmatpush.bf16.msrb.mxu3 %v3032_v25  ;;  %v4551_v6 = vld [vmem:[#allocation2 + $0x50c] sm:$0xf0]  ;;  %v3476_v15 = vor.u32 %v4519_v4, %v3475_v1  ;;  %v4545_v16 = vld [vmem:[#allocation2 + $0x4e4] sm:$0xf]  ;;  %v3589_v17 = vld [vmem:[#allocation2 + $0x4f0] sm:$0xf0]  ;;  %v3464_v25 = vor.u32 %v4513_v12, %v3461_v13 }
  0x3f   :  { %1370 = vmatpush.bf16.msra.mxu2 %v3176_v20  ;;  %1320 = vmatpush.bf16.msrb.mxu0 %v3524_v34  ;;  %v64_v18 = vld [vmem:[%s5142_s0 + $0x20] sm:$0xff]  ;;  %v3604_v19 = vor.u32 %v4551_v6, %v3603_v5  ;;  %v2968_v20 = vor.u32 %v4389_v8, %v2965_v9  ;;  %v3093_v22 = vld [vmem:[#allocation2 + $0x110] sm:$0xf0]  ;;  %v65_v23 = vld [vmem:[%s5142_s0 + $0x28] sm:$0xff]  ;;  %v3592_v29 = vor.u32 %v4545_v16, %v3589_v17 }
  0x40   :  { %1333 = vmatpush.bf16.msrb.mxu1 %v3652_v37  ;;  %v4421_v21 = vld [vmem:[#allocation2 + $0x104] sm:$0xf]  ;;  %v3717_v27 = vld [vmem:[#allocation2 + $0x5f0] sm:$0xf0]  ;;  %v4917_v30 = vpack.c.bf16 %v64_v18, %v64_v18  ;;  %v4919_v35 = vpack.c.bf16 %v65_v23, %v65_v23 }
  0x41   :  { %3745 = vmatmul.msk.bf16.vlgmr.msrb.gmra.mxu2 %vm1260_vm0, %v4907_v45  ;;  %v4577_v26 = vld [vmem:[#allocation2 + $0x5e4] sm:$0xf]  ;;  %v3317_v31 = vld [vmem:[#allocation2 + $0x2d0] sm:$0xf0]  ;;  %v3096_v34 = vor.u32 %v4421_v21, %v3093_v22 }
  0x42   :  { %1359 = vmatpush.bf16.msrb.mxu3 %v3016_v38  ;;  %v4477_v28 = vld [vmem:[#allocation2 + $0x2c4] sm:$0xf]  ;;  %v3573_v37 = vld [vmem:[#allocation2 + $0x4d0] sm:$0xf0]  ;;  %v3720_v38 = vor.u32 %v4577_v26, %v3717_v27 }
  0x43   :  { %1371 = vmatpush.bf16.msra.mxu2 %v3160_v33  ;;  %1321 = vmatpush.bf16.msrb.mxu0 %v3508_v47  ;;  %v4509_v32 = vld [vmem:[#allocation2 + $0x3c4] sm:$0xf]  ;;  %v3445_v33 = vld [vmem:[#allocation2 + $0x3d0] sm:$0xf0]  ;;  %v3320_v39 = vor.u32 %v4477_v28, %v3317_v31 }
  0x44   :  { %1334 = vmatpush.bf16.msrb.mxu1 %v3636_v50  ;;  %v4541_v36 = vld [vmem:[#allocation2 + $0x4c4] sm:$0xf]  ;;  %v3448_v40 = vor.u32 %v4509_v32, %v3445_v33  ;;  %v3701_v42 = vld [vmem:[#allocation2 + $0x5d0] sm:$0xf0] }
  0x45   :  { %v4573_v41 = vld [vmem:[#allocation2 + $0x5c4] sm:$0xf]  ;;  %v3576_v44 = vor.u32 %v4541_v36, %v3573_v37  ;;  %v3429_v48 = vld [vmem:[#allocation2 + $0x3b0] sm:$0xf0] }
  0x46   :  { %1360 = vmatpush.bf16.msrb.mxu3 %v3000_v52  ;;  %v4473_v43 = vld [vmem:[#allocation2 + $0x2a4] sm:$0xf]  ;;  %v3557_v50 = vld [vmem:[#allocation2 + $0x4b0] sm:$0xf0]  ;;  %v3704_v52 = vor.u32 %v4573_v41, %v3701_v42 }
  0x47   :  { %1372 = vmatpush.bf16.msra.mxu2 %v3144_v46  ;;  %1322 = vmatpush.bf16.msrb.mxu0 %v3492_v62  ;;  %v3301_v46 = vld [vmem:[#allocation2 + $0x2b0] sm:$0xf0]  ;;  %v4505_v47 = vld [vmem:[#allocation2 + $0x3a4] sm:$0xf] }
  0x48   :  { %1335 = vmatpush.bf16.msrb.mxu1 %v3620_v2  ;;  %v4537_v49 = vld [vmem:[#allocation2 + $0x4a4] sm:$0xf]  ;;  %v3304_v53 = vor.u32 %v4473_v43, %v3301_v46  ;;  %v3432_v54 = vor.u32 %v4505_v47, %v3429_v48  ;;  %v3685_v58 = vld [vmem:[#allocation2 + $0x5b0] sm:$0xf0] }
  0x49   :  { %v4569_v56 = vld [vmem:[#allocation2 + $0x5a4] sm:$0xf]  ;;  %v3560_v60 = vor.u32 %v4537_v49, %v3557_v50  ;;  %v3413_v63 = vld [vmem:[#allocation2 + $0x390] sm:$0xf0] }
  0x4a   :  { %1361 = vmatpush.bf16.msrb.mxu3 %v2984_v3  ;;  %v4469_v59 = vld [vmem:[#allocation2 + $0x284] sm:$0xf]  ;;  %v3541_v1 = vld [vmem:[#allocation2 + $0x490] sm:$0xf0]  ;;  %v3688_v2 = vor.u32 %v4569_v56, %v3685_v58  ;;  %v3083_v56 = vld [vmem:[#allocation2 + $0xe8] sm:$0xf] }
  0x4b   :  { %1373 = vmatpush.bf16.msra.mxu2 %v3128_v61  ;;  %1323 = vmatpush.bf16.msrb.mxu0 %v3476_v15  ;;  %v3285_v61 = vld [vmem:[#allocation2 + $0x290] sm:$0xf0]  ;;  %v4501_v62 = vld [vmem:[#allocation2 + $0x384] sm:$0xf]  ;;  %v4420_v58 = vld [vmem:[#allocation2 + $0xf4] sm:$0xf0] }
  0x4c   :  { %1336 = vmatpush.bf16.msrb.mxu1 %v3604_v19  ;;  %v4533_v0 = vld [vmem:[#allocation2 + $0x484] sm:$0xf]  ;;  %v3288_v3 = vor.u32 %v4469_v59, %v3285_v61  ;;  %v3416_v4 = vor.u32 %v4501_v62, %v3413_v63  ;;  %v3669_v6 = vld [vmem:[#allocation2 + $0x590] sm:$0xf0]  ;;  %v3339_v62 = vld [vmem:[#allocation2 + $0x2e8] sm:$0xf] }
  0x4d   :  { %v4565_v5 = vld [vmem:[#allocation2 + $0x584] sm:$0xf]  ;;  %v3544_v9 = vor.u32 %v4533_v0, %v3541_v1  ;;  %v3269_v10 = vld [vmem:[#allocation2 + $0x270] sm:$0xf0]  ;;  %v4484_v63 = vld [vmem:[#allocation2 + $0x2f4] sm:$0xf0] }
  0x4e   :  { %1362 = vmatpush.bf16.msrb.mxu3 %v2968_v20  ;;  %1324 = vmatmul.bf16.vlgmr.msrb.gmra.mxu0 %v4917_v30  ;;  %v4465_v8 = vld [vmem:[#allocation2 + $0x264] sm:$0xf]  ;;  %v3397_v12 = vld [vmem:[#allocation2 + $0x370] sm:$0xf0]  ;;  %v3672_v15 = vor.u32 %v4565_v5, %v3669_v6  ;;  %v3084_v5 = vor.u32 %v4420_v58, %v3083_v56  ;;  %v3467_v6 = vld [vmem:[#allocation2 + $0x3e8] sm:$0xf] }
  0x4f   :  { %1374 = vmatpush.bf16.msra.mxu2 %v3112_v14  ;;  %1381 = vmatpush.bf16.msra.mxu0 %v3336_v24  ;;  %v4497_v11 = vld [vmem:[#allocation2 + $0x364] sm:$0xf]  ;;  %v3525_v14 = vld [vmem:[#allocation2 + $0x470] sm:$0xf0]  ;;  %v3272_v16 = vor.u32 %v4465_v8, %v3269_v10  ;;  %v4516_v8 = vld [vmem:[#allocation2 + $0x3f4] sm:$0xf0] }
  0x50   :  { %1394 = vmatpush.bf16.msra.mxu1 %v3464_v25  ;;  %v4529_v13 = vld [vmem:[#allocation2 + $0x464] sm:$0xf]  ;;  %v3400_v17 = vor.u32 %v4497_v11, %v3397_v12  ;;  %v3653_v19 = vld [vmem:[#allocation2 + $0x570] sm:$0xf0]  ;;  %v3211_v10 = vld [vmem:[#allocation2 + $0x1e8] sm:$0xf]  ;;  %v3340_v12 = vor.u32 %v4484_v63, %v3339_v62 }
  0x51   :  { %1337 = vmatmul.bf16.vlgmr.msrb.gmra.mxu1 %v4919_v35  ;;  %1363 = vmatmul.bf16.vlgmr.msrb.gmra.mxu3 %v4891_v55  ;;  %v4561_v18 = vld [vmem:[#allocation2 + $0x564] sm:$0xf]  ;;  %v3528_v21 = vor.u32 %v4529_v13, %v3525_v14  ;;  %v3253_v22 = vld [vmem:[#allocation2 + $0x250] sm:$0xf0]  ;;  %v4452_v11 = vld [vmem:[#allocation2 + $0x1f4] sm:$0xf0] }
  0x52   :  { %1407 = vmatpush.bf16.msra.mxu3 %v3592_v29  ;;  %v4461_v20 = vld [vmem:[#allocation2 + $0x244] sm:$0xf]  ;;  %v3381_v24 = vld [vmem:[#allocation2 + $0x350] sm:$0xf0]  ;;  %v3656_v27 = vor.u32 %v4561_v18, %v3653_v19  ;;  %v3067_v14 = vld [vmem:[#allocation2 + $0xc8] sm:$0xf]  ;;  %v3212_v19 = vor.u32 %v4452_v11, %v3211_v10 }
  0x53   :  { %1375 = vmatpush.bf16.msra.mxu2 %v3096_v34  ;;  %1382 = vmatpush.bf16.msra.mxu0 %v3320_v39  ;;  %v4493_v23 = vld [vmem:[#allocation2 + $0x344] sm:$0xf]  ;;  %v3509_v26 = vld [vmem:[#allocation2 + $0x450] sm:$0xf0]  ;;  %v3256_v28 = vor.u32 %v4461_v20, %v3253_v22  ;;  %v4480_v18 = vld [vmem:[#allocation2 + $0x2d4] sm:$0xf0] }
  0x54   :  { %1395 = vmatpush.bf16.msra.mxu1 %v3448_v40  ;;  %v4525_v25 = vld [vmem:[#allocation2 + $0x444] sm:$0xf]  ;;  %v3384_v29 = vor.u32 %v4493_v23, %v3381_v24  ;;  %v3637_v32 = vld [vmem:[#allocation2 + $0x550] sm:$0xf0]  ;;  %v3451_v20 = vld [vmem:[#allocation2 + $0x3c8] sm:$0xf] }
  0x55   :  { %v4557_v31 = vld [vmem:[#allocation2 + $0x544] sm:$0xf]  ;;  %v3512_v34 = vor.u32 %v4525_v25, %v3509_v26  ;;  %v3237_v36 = vld [vmem:[#allocation2 + $0x230] sm:$0xf0]  ;;  %v3195_v23 = vld [vmem:[#allocation2 + $0x1c8] sm:$0xf] }
  0x56   :  { %1408 = vmatpush.bf16.msra.mxu3 %v3576_v44  ;;  %1376 = vmatmul.bf16.vlgmr.msra.gmra.mxu2 %v4900_v7  ;;  %v4457_v33 = vld [vmem:[#allocation2 + $0x224] sm:$0xf]  ;;  %v3493_v40 = vld [vmem:[#allocation2 + $0x430] sm:$0xf0]  ;;  %v3640_v41 = vor.u32 %v4557_v31, %v3637_v32  ;;  %v4448_v24 = vld [vmem:[#allocation2 + $0x1d4] sm:$0xf0] }
  0x57   :  { %1420 = vmatpush.bf16.msrb.mxu2 %v3720_v38  ;;  %1383 = vmatpush.bf16.msra.mxu0 %v3304_v53  ;;  %v4489_v37 = vld [vmem:[#allocation2 + $0x324] sm:$0xf]  ;;  %v3365_v38 = vld [vmem:[#allocation2 + $0x330] sm:$0xf0]  ;;  %v3240_v46 = vor.u32 %v4457_v33, %v3237_v36  ;;  %v3051_v26 = vld [vmem:[#allocation2 + $0xa8] sm:$0xf]  ;;  %v3196_v32 = vor.u32 %v4448_v24, %v3195_v23 }
  0x58   :  { %1396 = vmatpush.bf16.msra.mxu1 %v3432_v54  ;;  %v4521_v39 = vld [vmem:[#allocation2 + $0x424] sm:$0xf]  ;;  %v3621_v43 = vld [vmem:[#allocation2 + $0x530] sm:$0xf0]  ;;  %v3368_v47 = vor.u32 %v4489_v37, %v3365_v38  ;;  %v4476_v31 = vld [vmem:[#allocation2 + $0x2b4] sm:$0xf0] }
  0x59   :  { %v4553_v42 = vld [vmem:[#allocation2 + $0x524] sm:$0xf]  ;;  %v3221_v48 = vld [vmem:[#allocation2 + $0x210] sm:$0xf0]  ;;  %v3435_v33 = vld [vmem:[#allocation2 + $0x3a8] sm:$0xf] }
  0x5a   :  { %1409 = vmatpush.bf16.msra.mxu3 %v3560_v60  ;;  %v4453_v44 = vld [vmem:[#allocation2 + $0x204] sm:$0xf]  ;;  %v3349_v50 = vld [vmem:[#allocation2 + $0x310] sm:$0xf0]  ;;  %v3624_v60 = vor.u32 %v4553_v42, %v3621_v43  ;;  %v3179_v37 = vld [vmem:[#allocation2 + $0x1a8] sm:$0xf] }
  0x5b   :  { %1421 = vmatpush.bf16.msrb.mxu2 %v3704_v52  ;;  %1384 = vmatpush.bf16.msra.mxu0 %v3288_v3  ;;  %v4485_v49 = vld [vmem:[#allocation2 + $0x304] sm:$0xf]  ;;  %v3496_v52 = vor.u32 %v4521_v39, %v3493_v40  ;;  %v3477_v54 = vld [vmem:[#allocation2 + $0x410] sm:$0xf0]  ;;  %v3224_v0 = vor.u32 %v4453_v44, %v3221_v48  ;;  %v4444_v38 = vld [vmem:[#allocation2 + $0x1b4] sm:$0xf0] }
  0x5c   :  { %1397 = vmatpush.bf16.msra.mxu1 %v3416_v4  ;;  %v4517_v53 = vld [vmem:[#allocation2 + $0x404] sm:$0xf]  ;;  %v3733_v61 = vld [vmem:[#allocation2 + $0x610] sm:$0xf0]  ;;  %v3352_v1 = vor.u32 %v4485_v49, %v3349_v50  ;;  %v3035_v40 = vld [vmem:[#allocation2 + $0x88] sm:$0xf] }
  0x5d   :  { %v4581_v59 = vld [vmem:[#allocation2 + $0x604] sm:$0xf]  ;;  %v3605_v3 = vld [vmem:[#allocation2 + $0x510] sm:$0xf0]  ;;  %v3480_v4 = vor.u32 %v4517_v53, %v3477_v54  ;;  %v3291_v43 = vld [vmem:[#allocation2 + $0x288] sm:$0xf] }
  0x5e   :  { %1410 = vmatpush.bf16.msra.mxu3 %v3544_v9  ;;  %v3736_v9 = vor.u32 %v4581_v59, %v3733_v61  ;;  %v4472_v44 = vld [vmem:[#allocation2 + $0x294] sm:$0xf0]  ;;  %v3163_v50 = vld [vmem:[#allocation2 + $0x188] sm:$0xf] }
  0x5f   :  { %1422 = vmatpush.bf16.msrb.mxu2 %v3688_v2  ;;  %1385 = vmatpush.bf16.msra.mxu0 %v3272_v16  ;;  %v4549_v2 = vld [vmem:[#allocation2 + $0x504] sm:$0xf]  ;;  %v3468_v16 = vor.u32 %v4516_v8, %v3467_v6  ;;  %v4504_v48 = vld [vmem:[#allocation2 + $0x394] sm:$0xf0]  ;;  %v3292_v53 = vor.u32 %v4472_v44, %v3291_v43  ;;  %v3019_v54 = vld [vmem:[#allocation2 + $0x68] sm:$0xf] }
  0x60   :  { %1398 = vmatpush.bf16.msra.mxu1 %v3400_v17  ;;  %v3608_v13 = vor.u32 %v4549_v2, %v3605_v3  ;;  %v3323_v17 = vld [vmem:[#allocation2 + $0x2c8] sm:$0xf]  ;;  %v4404_v56 = vld [vmem:[#allocation2 + $0x74] sm:$0xf0] }
  0x61   :  { %v3324_v25 = vor.u32 %v4480_v18, %v3323_v17  ;;  %v3275_v59 = vld [vmem:[#allocation2 + $0x268] sm:$0xf]  ;;  %v4500_v63 = vld [vmem:[#allocation2 + $0x374] sm:$0xf0] }
  0x62   :  { %1411 = vmatpush.bf16.msra.mxu3 %v3528_v21  ;;  %v4512_v21 = vld [vmem:[#allocation2 + $0x3d4] sm:$0xf0]  ;;  %v3403_v62 = vld [vmem:[#allocation2 + $0x368] sm:$0xf] }
  0x63   :  { %1423 = vmatpush.bf16.msrb.mxu2 %v3672_v15  ;;  %1386 = vmatpush.bf16.msra.mxu0 %v3256_v28  ;;  %v4416_v15 = vld [vmem:[#allocation2 + $0xd4] sm:$0xf0]  ;;  %v3452_v28 = vor.u32 %v4512_v21, %v3451_v20  ;;  %v3404_v6 = vor.u32 %v4500_v63, %v3403_v62  ;;  %v3259_v8 = vld [vmem:[#allocation2 + $0x248] sm:$0xf] }
  0x64   :  { %1399 = vmatpush.bf16.msra.mxu1 %v3384_v29  ;;  %v3068_v22 = vor.u32 %v4416_v15, %v3067_v14  ;;  %v3307_v29 = vld [vmem:[#allocation2 + $0x2a8] sm:$0xf]  ;;  %v4436_v2 = vld [vmem:[#allocation2 + $0x174] sm:$0xf0] }
  0x65   :  { %v3308_v39 = vor.u32 %v4476_v31, %v3307_v29  ;;  %v3387_v11 = vld [vmem:[#allocation2 + $0x348] sm:$0xf]  ;;  %v4432_v15 = vld [vmem:[#allocation2 + $0x154] sm:$0xf0] }
  0x66   :  { %1412 = vmatpush.bf16.msra.mxu3 %v3512_v34  ;;  %v4508_v34 = vld [vmem:[#allocation2 + $0x3b4] sm:$0xf0]  ;;  %v3131_v14 = vld [vmem:[#allocation2 + $0x148] sm:$0xf] }
  0x67   :  { %1424 = vmatpush.bf16.msrb.mxu2 %v3656_v27  ;;  %1387 = vmatpush.bf16.msra.mxu0 %v3240_v46  ;;  %v4412_v27 = vld [vmem:[#allocation2 + $0xb4] sm:$0xf0]  ;;  %v3436_v42 = vor.u32 %v4508_v34, %v3435_v33  ;;  %v3180_v46 = vor.u32 %v4444_v38, %v3179_v37  ;;  %v2987_v17 = vld [vmem:[#allocation2 + $0x28] sm:$0xf] }
  0x68   :  { %1400 = vmatpush.bf16.msra.mxu1 %v3368_v47  ;;  %v3052_v36 = vor.u32 %v4412_v27, %v3051_v26  ;;  %v3419_v47 = vld [vmem:[#allocation2 + $0x388] sm:$0xf]  ;;  %v4396_v18 = vld [vmem:[#allocation2 + $0x34] sm:$0xf0] }
  0x69   :  { %v3420_v58 = vor.u32 %v4504_v48, %v3419_v47  ;;  %v3243_v20 = vld [vmem:[#allocation2 + $0x228] sm:$0xf]  ;;  %v4460_v21 = vld [vmem:[#allocation2 + $0x234] sm:$0xf0]  ;;  %v4418_v47 = vld [vmem:[#allocation2 + $0xec] sm:$0xf] }
  0x6a   :  { %1413 = vmatpush.bf16.msra.mxu3 %v3496_v52  ;;  %v4440_v52 = vld [vmem:[#allocation2 + $0x194] sm:$0xf0]  ;;  %v3371_v23 = vld [vmem:[#allocation2 + $0x328] sm:$0xf]  ;;  %v3244_v29 = vor.u32 %v4460_v21, %v3243_v20  ;;  %v3085_v48 = vld [vmem:[#allocation2 + $0xf8] sm:$0xf0] }
  0x6b   :  { %1425 = vmatpush.bf16.msrb.mxu2 %v3640_v41  ;;  %1388 = vmatpush.bf16.msra.mxu0 %v3224_v0  ;;  %v4408_v41 = vld [vmem:[#allocation2 + $0x94] sm:$0xf0]  ;;  %v3164_v61 = vor.u32 %v4440_v52, %v3163_v50  ;;  %v3020_v0 = vor.u32 %v4404_v56, %v3019_v54  ;;  %v3115_v26 = vld [vmem:[#allocation2 + $0x128] sm:$0xf]  ;;  %v3088_v63 = vor.u32 %v4418_v47, %v3085_v48 }
  0x6c   :  { %1401 = vmatpush.bf16.msra.mxu1 %v3352_v1  ;;  %v3036_v49 = vor.u32 %v4408_v41, %v3035_v40  ;;  %v3147_v1 = vld [vmem:[#allocation2 + $0x168] sm:$0xf]  ;;  %v4492_v24 = vld [vmem:[#allocation2 + $0x334] sm:$0xf0] }
  0x6d   :  { %v3148_v10 = vor.u32 %v4436_v2, %v3147_v1  ;;  %v4428_v27 = vld [vmem:[#allocation2 + $0x134] sm:$0xf0]  ;;  %v3372_v34 = vor.u32 %v4492_v24, %v3371_v23  ;;  %v3227_v37 = vld [vmem:[#allocation2 + $0x208] sm:$0xf]  ;;  %v4414_v1 = vld [vmem:[#allocation2 + $0xcc] sm:$0xf] }
  0x6e   :  { %1414 = vmatpush.bf16.msra.mxu3 %v3480_v4  ;;  %1389 = vmatmul.bf16.vlgmr.msra.gmra.mxu0 %v4889_v51  ;;  %v3003_v4 = vld [vmem:[#allocation2 + $0x48] sm:$0xf]  ;;  %v4392_v31 = vld [vmem:[#allocation2 + $0x14] sm:$0xf0]  ;;  %v3116_v40 = vor.u32 %v4428_v27, %v3115_v26  ;;  %v3069_v2 = vld [vmem:[#allocation2 + $0xd8] sm:$0xf0] }
  0x6f   :  { %1426 = vmatpush.bf16.msrb.mxu2 %v3624_v60  ;;  %1472 = vmatpush.bf16.msrb.mxu0 %v3340_v12  ;;  %v4468_v60 = vld [vmem:[#allocation2 + $0x274] sm:$0xf0]  ;;  %v3723_v52 = vld [vmem:[#allocation2 + $0x5e8] sm:$0xf]  ;;  %v3181_v23 = vld [vmem:[#allocation2 + $0x1b8] sm:$0xf0] }
  0x70   :  { %1446 = vmatpush.bf16.msrb.mxu1 %v3084_v5  ;;  %v3276_v3 = vor.u32 %v4468_v60, %v3275_v59  ;;  %v4400_v5 = vld [vmem:[#allocation2 + $0x54] sm:$0xf0]  ;;  %v3579_v54 = vld [vmem:[#allocation2 + $0x4c8] sm:$0xf]  ;;  %v4450_v60 = vld [vmem:[#allocation2 + $0x1ec] sm:$0xf] }
  0x71   :  { %1415 = vmatmul.bf16.vlgmr.msra.gmra.mxu3 %v4917_v30  ;;  %1402 = vmatmul.bf16.vlgmr.msra.gmra.mxu1 %v4893_v57  ;;  %v4496_v12 = vld [vmem:[#allocation2 + $0x354] sm:$0xf0]  ;;  %v3547_v20 = vld [vmem:[#allocation2 + $0x488] sm:$0xf]  ;;  %v4406_v26 = vld [vmem:[#allocation2 + $0x8c] sm:$0xf] }
  0x72   :  { %1440 = vmatpush.bf16.msrb.mxu3 %v3736_v9  ;;  %v4464_v9 = vld [vmem:[#allocation2 + $0x254] sm:$0xf0]  ;;  %v3037_v27 = vld [vmem:[#allocation2 + $0x98] sm:$0xf0]  ;;  %v3515_v47 = vld [vmem:[#allocation2 + $0x448] sm:$0xf] }
  0x73   :  { %1427 = vmatpush.bf16.msrb.mxu2 %v3608_v13  ;;  %1473 = vmatpush.bf16.msrb.mxu0 %v3324_v25  ;;  %v3004_v13 = vor.u32 %v4400_v5, %v3003_v4  ;;  %v2988_v25 = vor.u32 %v4396_v18, %v2987_v17  ;;  %v4548_v33 = vld [vmem:[#allocation2 + $0x4f4] sm:$0xf0]  ;;  %v3707_v5 = vld [vmem:[#allocation2 + $0x5c8] sm:$0xf] }
  0x74   :  { %1447 = vmatpush.bf16.msrb.mxu1 %v3068_v22  ;;  %v3132_v22 = vor.u32 %v4432_v15, %v3131_v14  ;;  %v4456_v38 = vld [vmem:[#allocation2 + $0x214] sm:$0xf0]  ;;  %v4410_v14 = vld [vmem:[#allocation2 + $0xac] sm:$0xf]  ;;  %v3053_v15 = vld [vmem:[#allocation2 + $0xb8] sm:$0xf0] }
  0x75   :  { %v4488_v41 = vld [vmem:[#allocation2 + $0x314] sm:$0xf0]  ;;  %v3228_v50 = vor.u32 %v4456_v38, %v3227_v37  ;;  %v3691_v18 = vld [vmem:[#allocation2 + $0x5a8] sm:$0xf]  ;;  %v3056_v24 = vor.u32 %v4410_v14, %v3053_v15  ;;  %v3165_v37 = vld [vmem:[#allocation2 + $0x198] sm:$0xf0]  ;;  %v3040_v38 = vor.u32 %v4406_v26, %v3037_v27 }
  0x76   :  { %1459 = vmatpush.bf16.msra.mxu3 %v3212_v19  ;;  %1428 = vmatmul.bf16.vlgmr.msrb.gmra.mxu2 %v4919_v35  ;;  %v3388_v19 = vor.u32 %v4496_v12, %v3387_v11  ;;  %v4584_v43 = vld [vmem:[#allocation2 + $0x614] sm:$0xf0]  ;;  %v3197_v11 = vld [vmem:[#allocation2 + $0x1d8] sm:$0xf0]  ;;  %v3072_v12 = vor.u32 %v4414_v1, %v3069_v2 }
  0x77   :  { %1485 = vmatpush.bf16.msra.mxu2 %v3468_v16  ;;  %1474 = vmatpush.bf16.msrb.mxu0 %v3308_v39  ;;  %v3260_v16 = vor.u32 %v4464_v9, %v3259_v8  ;;  %v3355_v39 = vld [vmem:[#allocation2 + $0x308] sm:$0xf]  ;;  %v4540_v9 = vld [vmem:[#allocation2 + $0x4b4] sm:$0xf0]  ;;  %v3133_v1 = vld [vmem:[#allocation2 + $0x158] sm:$0xf0] }
  0x78   :  { %1448 = vmatpush.bf16.msrb.mxu1 %v3052_v36  ;;  %v3099_v36 = vld [vmem:[#allocation2 + $0x108] sm:$0xf]  ;;  %v3356_v56 = vor.u32 %v4488_v41, %v3355_v39  ;;  %v4536_v21 = vld [vmem:[#allocation2 + $0x494] sm:$0xf0]  ;;  %v3021_v41 = vld [vmem:[#allocation2 + $0x78] sm:$0xf0] }
  0x79   :  { %v3563_v8 = vld [vmem:[#allocation2 + $0x4a8] sm:$0xf]  ;;  %v4528_v48 = vld [vmem:[#allocation2 + $0x454] sm:$0xf0]  ;;  %v3117_v14 = vld [vmem:[#allocation2 + $0x138] sm:$0xf0] }
  0x7a   :  { %1460 = vmatpush.bf16.msra.mxu3 %v3196_v32  ;;  %v3595_v32 = vld [vmem:[#allocation2 + $0x4e8] sm:$0xf]  ;;  %v3469_v26 = vld [vmem:[#allocation2 + $0x3f8] sm:$0xf0] }
  0x7b   :  { %1486 = vmatpush.bf16.msra.mxu2 %v3452_v28  ;;  %1475 = vmatpush.bf16.msrb.mxu0 %v3292_v53  ;;  %v2971_v28 = vld [vmem:[#allocation2 + $0x8] sm:$0xf]  ;;  %v4580_v53 = vld [vmem:[#allocation2 + $0x5f4] sm:$0xf0] }
  0x7c   :  { %1449 = vmatpush.bf16.msrb.mxu1 %v3036_v49  ;;  %v2972_v44 = vor.u32 %v4392_v31, %v2971_v28  ;;  %v3596_v49 = vor.u32 %v4548_v33, %v3595_v32  ;;  %v3548_v28 = vor.u32 %v4536_v21, %v3547_v20  ;;  %v3675_v31 = vld [vmem:[#allocation2 + $0x588] sm:$0xf]  ;;  %v4568_v32 = vld [vmem:[#allocation2 + $0x594] sm:$0xf0]  ;;  %v4390_v20 = vld [vmem:[#allocation2 + $0xc] sm:$0xf] }
  0x7d   :  { %v3531_v33 = vld [vmem:[#allocation2 + $0x468] sm:$0xf]  ;;  %v3676_v39 = vor.u32 %v4568_v32, %v3675_v31  ;;  %v2973_v21 = vld [vmem:[#allocation2 + $0x18] sm:$0xf0]  ;;  %v4478_v31 = vld [vmem:[#allocation2 + $0x2cc] sm:$0xf] }
  0x7e   :  { %1461 = vmatpush.bf16.msra.mxu3 %v3180_v46  ;;  %v4424_v46 = vld [vmem:[#allocation2 + $0x114] sm:$0xf0]  ;;  %v2976_v32 = vor.u32 %v4390_v20, %v2973_v21  ;;  %v4498_v20 = vld [vmem:[#allocation2 + $0x36c] sm:$0xf] }
  0x7f   :  { %1487 = vmatpush.bf16.msra.mxu2 %v3436_v42  ;;  %1476 = vmatpush.bf16.msrb.mxu0 %v3276_v3  ;;  %v3739_v42 = vld [vmem:[#allocation2 + $0x608] sm:$0xf]  ;;  %v3100_v62 = vor.u32 %v4424_v46, %v3099_v36  ;;  %v4438_v36 = vld [vmem:[#allocation2 + $0x18c] sm:$0xf]  ;;  %v4564_v46 = vld [vmem:[#allocation2 + $0x574] sm:$0xf0] }
  0x80   :  { %1450 = vmatpush.bf16.msrb.mxu1 %v3020_v0  ;;  %v3740_v59 = vor.u32 %v4584_v43, %v3739_v42  ;;  %v3724_v0 = vor.u32 %v4580_v53, %v3723_v52  ;;  %v3168_v43 = vor.u32 %v4438_v36, %v3165_v37  ;;  %v3101_v36 = vld [vmem:[#allocation2 + $0x118] sm:$0xf0] }
  0x81   :  { %3746 = vmatmul.msk.bf16.vlgmr.msrb.gmra.mxu3 %vm1260_vm0, %v4907_v45 }
  0x82   :  { %1462 = vmatpush.bf16.msra.mxu3 %v3164_v61  ;;  %v3213_v61 = vld [vmem:[#allocation2 + $0x1f8] sm:$0xf0] }
  0x83   :  { %1488 = vmatpush.bf16.msra.mxu2 %v3420_v58  ;;  %1477 = vmatpush.bf16.msrb.mxu0 %v3260_v16  ;;  %v4544_v58 = vld [vmem:[#allocation2 + $0x4d4] sm:$0xf0]  ;;  %v3216_v4 = vor.u32 %v4450_v60, %v3213_v61  ;;  %v3564_v16 = vor.u32 %v4540_v9, %v3563_v8  ;;  %v3643_v60 = vld [vmem:[#allocation2 + $0x548] sm:$0xf] }
  0x84   :  { %1451 = vmatpush.bf16.msrb.mxu1 %v3004_v13  ;;  %v3580_v3 = vor.u32 %v4544_v58, %v3579_v54  ;;  %v4398_v54 = vld [vmem:[#allocation2 + $0x4c] sm:$0xf]  ;;  %v3516_v58 = vor.u32 %v4528_v48, %v3515_v47  ;;  %v4560_v61 = vld [vmem:[#allocation2 + $0x554] sm:$0xf0]  ;;  %v3627_v9 = vld [vmem:[#allocation2 + $0x528] sm:$0xf] }
  0x85   :  { %v4542_v47 = vld [vmem:[#allocation2 + $0x4cc] sm:$0xf]  ;;  %v3581_v48 = vld [vmem:[#allocation2 + $0x4d8] sm:$0xf0] }
  0x86   :  { %1463 = vmatpush.bf16.msra.mxu3 %v3148_v10  ;;  %v4446_v10 = vld [vmem:[#allocation2 + $0x1cc] sm:$0xf] }
  0x87   :  { %1489 = vmatpush.bf16.msra.mxu2 %v3404_v6  ;;  %1478 = vmatpush.bf16.msrb.mxu0 %v3244_v29  ;;  %v4576_v6 = vld [vmem:[#allocation2 + $0x5d4] sm:$0xf0]  ;;  %v3200_v17 = vor.u32 %v4446_v10, %v3197_v11  ;;  %v3483_v11 = vld [vmem:[#allocation2 + $0x408] sm:$0xf] }
  0x88   :  { %1452 = vmatpush.bf16.msrb.mxu1 %v2988_v25  ;;  %v3708_v13 = vor.u32 %v4576_v6, %v3707_v5  ;;  %v2989_v5 = vld [vmem:[#allocation2 + $0x38] sm:$0xf0]  ;;  %v4556_v10 = vld [vmem:[#allocation2 + $0x534] sm:$0xf0] }
  0x8a   :  { %1464 = vmatpush.bf16.msra.mxu3 %v3132_v22  ;;  %v4442_v22 = vld [vmem:[#allocation2 + $0x1ac] sm:$0xf] }
  0x8b   :  { %1490 = vmatpush.bf16.msra.mxu2 %v3388_v19  ;;  %1479 = vmatpush.bf16.msrb.mxu0 %v3228_v50  ;;  %v4572_v19 = vld [vmem:[#allocation2 + $0x5b4] sm:$0xf0]  ;;  %v3184_v29 = vor.u32 %v4442_v22, %v3181_v23  ;;  %v3149_v50 = vld [vmem:[#allocation2 + $0x178] sm:$0xf0] }
  0x8c   :  { %1453 = vmatpush.bf16.msrb.mxu1 %v2972_v44  ;;  %v3692_v25 = vor.u32 %v4572_v19, %v3691_v18  ;;  %v3659_v44 = vld [vmem:[#allocation2 + $0x568] sm:$0xf]  ;;  %v3628_v18 = vor.u32 %v4556_v10, %v3627_v9  ;;  %v3421_v10 = vld [vmem:[#allocation2 + $0x398] sm:$0xf0] }
  0x8d   :  { %v3660_v53 = vor.u32 %v4564_v46, %v3659_v44  ;;  %v3611_v19 = vld [vmem:[#allocation2 + $0x508] sm:$0xf]  ;;  %v3453_v46 = vld [vmem:[#allocation2 + $0x3d8] sm:$0xf0] }
  0x8e   :  { %1465 = vmatpush.bf16.msra.mxu3 %v3116_v40  ;;  %1480 = vmatmul.bf16.vlgmr.msrb.gmra.mxu0 %v4889_v51  ;;  %v4402_v40 = vld [vmem:[#allocation2 + $0x6c] sm:$0xf] }
  0x8f   :  { %1491 = vmatpush.bf16.msra.mxu2 %v3372_v34  ;;  %1531 = vmatpush.bf16.msra.mxu0 %v3740_v59  ;;  %v4532_v34 = vld [vmem:[#allocation2 + $0x474] sm:$0xf0]  ;;  %v3024_v52 = vor.u32 %v4402_v40, %v3021_v41 }
  0x90   :  { %1498 = vmatpush.bf16.msra.mxu1 %v3596_v49  ;;  %v3532_v42 = vor.u32 %v4532_v34, %v3531_v33  ;;  %v4434_v49 = vld [vmem:[#allocation2 + $0x16c] sm:$0xf]  ;;  %v3325_v33 = vld [vmem:[#allocation2 + $0x2d8] sm:$0xf0] }
  0x91   :  { %1454 = vmatmul.bf16.vlgmr.msrb.gmra.mxu1 %v4891_v55  ;;  %v3152_v59 = vor.u32 %v4434_v49, %v3149_v50  ;;  %v4422_v34 = vld [vmem:[#allocation2 + $0x10c] sm:$0xf] }
  0x92   :  { %1466 = vmatpush.bf16.msra.mxu3 %v3100_v62  ;;  %v3499_v62 = vld [vmem:[#allocation2 + $0x428] sm:$0xf]  ;;  %v3104_v44 = vor.u32 %v4422_v34, %v3101_v36  ;;  %v4474_v50 = vld [vmem:[#allocation2 + $0x2ac] sm:$0xf] }
  0x93   :  { %1492 = vmatpush.bf16.msra.mxu2 %v3356_v56  ;;  %1550 = vmatpush.bf16.msrb.mxu0 %v3216_v4  ;;  %v3005_v56 = vld [vmem:[#allocation2 + $0x58] sm:$0xf0]  ;;  %v4394_v4 = vld [vmem:[#allocation2 + $0x2c] sm:$0xf] }
  0x94   :  { %1499 = vmatpush.bf16.msra.mxu1 %v3580_v3  ;;  %v3008_v2 = vor.u32 %v4398_v54, %v3005_v56  ;;  %v3644_v3 = vor.u32 %v4560_v61, %v3643_v60  ;;  %v2992_v15 = vor.u32 %v4394_v4, %v2989_v5  ;;  %v3709_v54 = vld [vmem:[#allocation2 + $0x5d8] sm:$0xf0]  ;;  %v4494_v34 = vld [vmem:[#allocation2 + $0x34c] sm:$0xf] }
  0x95   :  { %1467 = vmatmul.bf16.vlgmr.msra.gmra.mxu3 %v4900_v7  ;;  %v3437_v61 = vld [vmem:[#allocation2 + $0x3b8] sm:$0xf0] }
  0x96   :  { %1511 = vmatpush.bf16.msrb.mxu3 %v3724_v0  ;;  %1493 = vmatmul.bf16.vlgmr.msra.gmra.mxu2 %v4893_v57  ;;  %v4430_v0 = vld [vmem:[#allocation2 + $0x14c] sm:$0xf]  ;;  %v3693_v4 = vld [vmem:[#allocation2 + $0x5b8] sm:$0xf0] }
  0x97   :  { %1537 = vmatpush.bf16.msrb.mxu2 %v3088_v63  ;;  %1551 = vmatpush.bf16.msrb.mxu0 %v3200_v17  ;;  %v4524_v63 = vld [vmem:[#allocation2 + $0x434] sm:$0xf0]  ;;  %v3136_v8 = vor.u32 %v4430_v0, %v3133_v1  ;;  %v3341_v17 = vld [vmem:[#allocation2 + $0x2f8] sm:$0xf0]  ;;  %v4470_v1 = vld [vmem:[#allocation2 + $0x28c] sm:$0xf] }
  0x98   :  { %1500 = vmatpush.bf16.msra.mxu1 %v3564_v16  ;;  %v3500_v6 = vor.u32 %v4524_v63, %v3499_v62  ;;  %v4482_v16 = vld [vmem:[#allocation2 + $0x2ec] sm:$0xf]  ;;  %v3565_v63 = vld [vmem:[#allocation2 + $0x4b8] sm:$0xf0] }
  0x99   :  { %v3344_v27 = vor.u32 %v4482_v16, %v3341_v17  ;;  %v4538_v62 = vld [vmem:[#allocation2 + $0x4ac] sm:$0xf]  ;;  %v3677_v17 = vld [vmem:[#allocation2 + $0x598] sm:$0xf0] }
  0x9a   :  { %1512 = vmatpush.bf16.msrb.mxu3 %v3708_v13  ;;  %v4426_v13 = vld [vmem:[#allocation2 + $0x12c] sm:$0xf] }
  0x9b   :  { %1538 = vmatpush.bf16.msrb.mxu2 %v3072_v12  ;;  %1552 = vmatpush.bf16.msrb.mxu0 %v3184_v29  ;;  %v4520_v12 = vld [vmem:[#allocation2 + $0x414] sm:$0xf0]  ;;  %v3120_v23 = vor.u32 %v4426_v13, %v3117_v14  ;;  %v3597_v29 = vld [vmem:[#allocation2 + $0x4f8] sm:$0xf0]  ;;  %v4466_v14 = vld [vmem:[#allocation2 + $0x26c] sm:$0xf] }
  0x9c   :  { %1501 = vmatpush.bf16.msra.mxu1 %v3548_v28  ;;  %v3484_v22 = vor.u32 %v4520_v12, %v3483_v11  ;;  %v4546_v28 = vld [vmem:[#allocation2 + $0x4ec] sm:$0xf]  ;;  %v3549_v12 = vld [vmem:[#allocation2 + $0x498] sm:$0xf0] }
  0x9d   :  { %v3600_v41 = vor.u32 %v4546_v28, %v3597_v29  ;;  %v4534_v11 = vld [vmem:[#allocation2 + $0x48c] sm:$0xf]  ;;  %v3661_v29 = vld [vmem:[#allocation2 + $0x578] sm:$0xf0] }
  0x9e   :  { %1513 = vmatpush.bf16.msrb.mxu3 %v3692_v25  ;;  %3747 = vmatmul.msk.bf16.vlgmr.msra.gmra.mxu0 %vm1260_vm0, %v4907_v45  ;;  %v4514_v25 = vld [vmem:[#allocation2 + $0x3ec] sm:$0xf] }
  0x9f   :  { %1539 = vmatpush.bf16.msrb.mxu2 %v3056_v24  ;;  %1553 = vmatpush.bf16.msrb.mxu0 %v3168_v43  ;;  %v4552_v24 = vld [vmem:[#allocation2 + $0x514] sm:$0xf0]  ;;  %v3472_v40 = vor.u32 %v4514_v25, %v3469_v26  ;;  %v3328_v43 = vor.u32 %v4478_v31, %v3325_v33  ;;  %v4462_v26 = vld [vmem:[#allocation2 + $0x24c] sm:$0xf] }
  0xa0   :  { %1502 = vmatpush.bf16.msra.mxu1 %v3532_v42  ;;  %v3612_v37 = vor.u32 %v4552_v24, %v3611_v19  ;;  %v4510_v42 = vld [vmem:[#allocation2 + $0x3cc] sm:$0xf]  ;;  %v3552_v19 = vor.u32 %v4534_v11, %v3549_v12  ;;  %v3533_v24 = vld [vmem:[#allocation2 + $0x478] sm:$0xf0] }
  0xa1   :  { %v3456_v56 = vor.u32 %v4510_v42, %v3453_v46  ;;  %v4562_v28 = vld [vmem:[#allocation2 + $0x56c] sm:$0xf]  ;;  %v3485_v11 = vld [vmem:[#allocation2 + $0x418] sm:$0xf0] }
  0xa2   :  { %1514 = vmatpush.bf16.msrb.mxu3 %v3676_v39  ;;  %v3725_v39 = vld [vmem:[#allocation2 + $0x5f8] sm:$0xf0]  ;;  %v4458_v42 = vld [vmem:[#allocation2 + $0x22c] sm:$0xf] }
  0xa3   :  { %1540 = vmatpush.bf16.msrb.mxu2 %v3040_v38  ;;  %1554 = vmatpush.bf16.msrb.mxu0 %v3152_v59  ;;  %v4578_v38 = vld [vmem:[#allocation2 + $0x5ec] sm:$0xf] }
  0xa4   :  { %1503 = vmatpush.bf16.msra.mxu1 %v3516_v58  ;;  %v3728_v49 = vor.u32 %v4578_v38, %v3725_v39  ;;  %v3584_v58 = vor.u32 %v4542_v47, %v3581_v48  ;;  %v4506_v59 = vld [vmem:[#allocation2 + $0x3ac] sm:$0xf]  ;;  %v3389_v38 = vld [vmem:[#allocation2 + $0x358] sm:$0xf0] }
  0xa5   :  { %v3440_v5 = vor.u32 %v4506_v59, %v3437_v61  ;;  %v4526_v39 = vld [vmem:[#allocation2 + $0x44c] sm:$0xf]  ;;  %v3645_v47 = vld [vmem:[#allocation2 + $0x558] sm:$0xf0]  ;;  %v3392_v48 = vor.u32 %v4494_v34, %v3389_v38  ;;  %v3831_v38 = vld [vmem:[#allocation5 + $0xa0] sm:$0xf] }
  0xa6   :  { %1515 = vmatpush.bf16.msrb.mxu3 %v3660_v53  ;;  %v4574_v53 = vld [vmem:[#allocation2 + $0x5cc] sm:$0xf] }
  0xa7   :  { %1541 = vmatpush.bf16.msrb.mxu2 %v3024_v52  ;;  %1555 = vmatpush.bf16.msrb.mxu0 %v3136_v8  ;;  %v3309_v52 = vld [vmem:[#allocation2 + $0x2b8] sm:$0xf0]  ;;  %v3712_v0 = vor.u32 %v4574_v53, %v3709_v54  ;;  %v4502_v8 = vld [vmem:[#allocation2 + $0x38c] sm:$0xf] }
  0xa8   :  { %1504 = vmatpush.bf16.msra.mxu1 %v3500_v6  ;;  %v3312_v60 = vor.u32 %v4474_v50, %v3309_v52  ;;  %v3568_v6 = vor.u32 %v4538_v62, %v3565_v63  ;;  %v4558_v46 = vld [vmem:[#allocation2 + $0x54c] sm:$0xf]  ;;  %v3373_v53 = vld [vmem:[#allocation2 + $0x338] sm:$0xf0] }
  0xa9   :  { %v4490_v50 = vld [vmem:[#allocation2 + $0x32c] sm:$0xf]  ;;  %v3629_v63 = vld [vmem:[#allocation2 + $0x538] sm:$0xf0] }
  0xaa   :  { %1516 = vmatpush.bf16.msrb.mxu3 %v3644_v3  ;;  %v4570_v3 = vld [vmem:[#allocation2 + $0x5ac] sm:$0xf] }
  0xab   :  { %1542 = vmatpush.bf16.msrb.mxu2 %v3008_v2  ;;  %1556 = vmatpush.bf16.msrb.mxu0 %v3120_v23  ;;  %v3293_v2 = vld [vmem:[#allocation2 + $0x298] sm:$0xf0]  ;;  %v3696_v13 = vor.u32 %v4570_v3, %v3693_v4  ;;  %v4530_v23 = vld [vmem:[#allocation2 + $0x46c] sm:$0xf]  ;;  %v3376_v4 = vor.u32 %v4490_v50, %v3373_v53 }
  0xac   :  { %1505 = vmatpush.bf16.msra.mxu1 %v3484_v22  ;;  %v3296_v9 = vor.u32 %v4470_v1, %v3293_v2  ;;  %v3405_v22 = vld [vmem:[#allocation2 + $0x378] sm:$0xf0]  ;;  %v4943_v25 = vpop.f32.mrf.mxu1  ;;  %v3536_v33 = vor.u32 %v4530_v23, %v3533_v24  ;;  %v4522_v54 = vld [vmem:[#allocation2 + $0x42c] sm:$0xf]  ;;  %v4952_v2 = vld [vmem:[%s5144_s2] sm:$0xf] }
  0xad   :  { %v4454_v59 = vld [vmem:[#allocation2 + $0x20c] sm:$0xf]  ;;  %v3741_v1 = vld [vmem:[#allocation2 + $0x618] sm:$0xf0] }
  0xae   :  { %1517 = vmatpush.bf16.msrb.mxu3 %v3628_v18  ;;  %v3424_v18 = vor.u32 %v4502_v8, %v3421_v10  ;;  %v4554_v61 = vld [vmem:[#allocation2 + $0x52c] sm:$0xf] }
  0xaf   :  { %1543 = vmatpush.bf16.msrb.mxu2 %v2992_v15  ;;  %1506 = vmatmul.bf16.vlgmr.msra.gmra.mxu1 %v4917_v30  ;;  %v3277_v15 = vld [vmem:[#allocation2 + $0x278] sm:$0xf0]  ;;  %v4941_v16 = vpop.f32.mrf.mxu0  ;;  %v4518_v10 = vld [vmem:[#allocation2 + $0x40c] sm:$0xf] }
  0xb0   :  { %1563 = vmatpush.bf16.msrb.mxu1 %v3344_v27  ;;  %1557 = vmatpush.bf16.msrb.mxu0 %v3104_v44  ;;  %v3280_v21 = vor.u32 %v4466_v14, %v3277_v15  ;;  %v3261_v27 = vld [vmem:[#allocation2 + $0x258] sm:$0xf0]  ;;  %v3863_v14 = vld [vmem:[#allocation5 + $0xe0] sm:$0xf]  ;;  %v4615_v15 = vld [vmem:[#allocation5 + $0xec] sm:$0xf0]  ;;  %v3488_v23 = vor.u32 %v4518_v10, %v3485_v11 }
  0xb1   :  { %v3264_v36 = vor.u32 %v4462_v26, %v3261_v27  ;;  %v3864_v24 = vor.u32 %v4615_v15, %v3863_v14  ;;  %v3847_v26 = vld [vmem:[#allocation5 + $0xc0] sm:$0xf]  ;;  %v4611_v27 = vld [vmem:[#allocation5 + $0xcc] sm:$0xf0] }
  0xb2   :  { %1518 = vmatpush.bf16.msrb.mxu3 %v3612_v37  ;;  %v3895_v11 = vld [vmem:[#allocation5 + $0x120] sm:$0xf]  ;;  %v4587_v15 = vld [vmem:[#allocation5 + $0xc] sm:$0xf0] }
  0xb3   :  { %1544 = vmatpush.bf16.msrb.mxu2 %v2976_v32  ;;  %1558 = vmatmul.bf16.vlgmr.msrb.gmra.mxu0 %v4900_v7  ;;  %v3408_v32 = vor.u32 %v4498_v20, %v3405_v22  ;;  %v4647_v20 = vld [vmem:[#allocation5 + $0x1ec] sm:$0xf0]  ;;  %v3751_v14 = vld [vmem:[#allocation5] sm:$0xf] }
  0xb4   :  { %1564 = vmatpush.bf16.msrb.mxu1 %v3328_v43  ;;  %1602 = vmatpush.bf16.msra.mxu0 %v3728_v49  ;;  %v4945_v31 = vpop.f32.mrf.mxu2  ;;  %v4947_v37 = vpop.f32.mrf.mxu3  ;;  %v3245_v43 = vld [vmem:[#allocation2 + $0x238] sm:$0xf0] }
  0xb5   :  { %1519 = vmatmul.bf16.vlgmr.msrb.gmra.mxu3 %v4919_v35  ;;  %v3248_v52 = vor.u32 %v4458_v42, %v3245_v43  ;;  %v1288_v62 = vpop.f32.mrf.mxu1  ;;  %v4639_v42 = vld [vmem:[#allocation5 + $0x1ac] sm:$0xf0] }
  0xb6   :  { %1576 = vmatpush.bf16.msra.mxu3 %v3472_v40  ;;  %1545 = vmatmul.bf16.vlgmr.msrb.gmra.mxu2 %v4891_v55  ;;  %v4566_v55 = vld [vmem:[#allocation2 + $0x58c] sm:$0xf]  ;;  %v3517_v40 = vld [vmem:[#allocation2 + $0x458] sm:$0xf0]  ;;  %v4595_v62 = vld [vmem:[#allocation5 + $0x4c] sm:$0xf0] }
  0xb7   :  { %1589 = vmatpush.bf16.msra.mxu2 %v3600_v41  ;;  %v3680_v7 = vor.u32 %v4566_v55, %v3677_v17  ;;  %v3664_v41 = vor.u32 %v4562_v28, %v3661_v29  ;;  %v1275_v44 = vpop.f32.mrf.mxu0  ;;  %v3520_v49 = vor.u32 %v4526_v39, %v3517_v40  ;;  %v4550_v55 = vld [vmem:[#allocation2 + $0x50c] sm:$0xf]  ;;  %v3975_v29 = vld [vmem:[#allocation5 + $0x1c0] sm:$0xf]  ;;  %v4607_v39 = vld [vmem:[#allocation5 + $0xac] sm:$0xf0] }
  0xb8   :  { %1565 = vmatpush.bf16.msrb.mxu1 %v3312_v60  ;;  %1603 = vmatpush.bf16.msra.mxu0 %v3712_v0  ;;  %v3229_v60 = vld [vmem:[#allocation2 + $0x218] sm:$0xf0]  ;;  %v4582_v0 = vld [vmem:[#allocation2 + $0x60c] sm:$0xf]  ;;  %v4603_v44 = vld [vmem:[#allocation5 + $0x8c] sm:$0xf0] }
  0xb9   :  { %v3232_v8 = vor.u32 %v4454_v59, %v3229_v60  ;;  %v3744_v17 = vor.u32 %v4582_v0, %v3741_v1  ;;  %v3911_v0 = vld [vmem:[#allocation5 + $0x140] sm:$0xf]  ;;  %v4627_v1 = vld [vmem:[#allocation5 + $0x14c] sm:$0xf0] }
  0xba   :  { %1577 = vmatpush.bf16.msra.mxu3 %v3456_v56  ;;  %v3501_v56 = vld [vmem:[#allocation2 + $0x438] sm:$0xf0]  ;;  %v3912_v10 = vor.u32 %v4627_v1, %v3911_v0  ;;  %v4663_v0 = vld [vmem:[#allocation5 + $0x26c] sm:$0xf0]  ;;  %v273_v1 = vperm.slane %v4952_v2, 1 }
  0xbb   :  { %1590 = vmatpush.bf16.msra.mxu2 %v3584_v58  ;;  %v3648_v58 = vor.u32 %v4558_v46, %v3645_v47 }
  0xbc   :  { %1566 = vmatpush.bf16.msrb.mxu1 %v3296_v9  ;;  %1604 = vmatpush.bf16.msra.mxu0 %v3696_v13  ;;  %v1301_v3 = vpop.f32.mrf.mxu2  ;;  %v3357_v9 = vld [vmem:[#allocation2 + $0x318] sm:$0xf0]  ;;  %v1314_v12 = vpop.f32.mrf.mxu3  ;;  %v3632_v13 = vor.u32 %v4554_v61, %v3629_v63  ;;  %v3783_v61 = vld [vmem:[#allocation5 + $0x40] sm:$0xf] }
  0xbd   :  { %v4623_v12 = vld [vmem:[#allocation5 + $0x12c] sm:$0xf0] }
  0xbe   :  { %1578 = vmatpush.bf16.msra.mxu3 %v3440_v5  ;;  %v3504_v5 = vor.u32 %v4522_v54, %v3501_v56  ;;  %v4599_v54 = vld [vmem:[#allocation5 + $0x6c] sm:$0xf0]  ;;  %v3927_v56 = vld [vmem:[#allocation5 + $0x160] sm:$0xf] }
  0xbf   :  { %1591 = vmatpush.bf16.msra.mxu2 %v3568_v6  ;;  %v4486_v6 = vld [vmem:[#allocation2 + $0x30c] sm:$0xf] }
  0xc0   :  { %1567 = vmatpush.bf16.msrb.mxu1 %v3280_v21  ;;  %1605 = vmatpush.bf16.msra.mxu0 %v3680_v7  ;;  %v272_v21 = vperm.slane %v4952_v2, 0  ;;  %v3360_v22 = vor.u32 %v4486_v6, %v3357_v9  ;;  %v4591_v9 = vld [vmem:[#allocation5 + $0x2c] sm:$0xf0] }
  0xc2   :  { %1579 = vmatpush.bf16.msra.mxu3 %v3424_v18  ;;  %v3613_v18 = vld [vmem:[#allocation2 + $0x518] sm:$0xf0] }
  0xc3   :  { %1592 = vmatpush.bf16.msra.mxu2 %v3552_v19  ;;  %v3991_v19 = vld [vmem:[#allocation5 + $0x1e0] sm:$0xf]  ;;  %v3616_v7 = vor.u32 %v4550_v55, %v3613_v18 }
  0xc4   :  { %1568 = vmatpush.bf16.msrb.mxu1 %v3264_v36  ;;  %1606 = vmatpush.bf16.msra.mxu0 %v3664_v41  ;;  %v3992_v28 = vor.u32 %v4647_v20, %v3991_v19  ;;  %v4957_v34 = vpop.f32.mrf.mxu2  ;;  %v3848_v36 = vor.u32 %v4611_v27, %v3847_v26  ;;  %v3959_v41 = vld [vmem:[#allocation5 + $0x1a0] sm:$0xf]  ;;  %v4679_v19 = vld [vmem:[#allocation5 + $0x2ec] sm:$0xf0]  ;;  %v3993_v26 = vld [vmem:[#allocation5 + $0x1f0] sm:$0xf0]  ;;  %v3752_v27 = vor.u32 %v4587_v15, %v3751_v14 }
  0xc5   :  { %v3960_v46 = vor.u32 %v4639_v42, %v3959_v41  ;;  %v4119_v18 = vld [vmem:[#allocation5 + $0x2e0] sm:$0xf]  ;;  %v4641_v42 = vld [vmem:[#allocation5 + $0x1c4] sm:$0xf] }
  0xc6   :  { %1580 = vmatpush.bf16.msra.mxu3 %v3408_v32  ;;  %v4643_v32 = vld [vmem:[#allocation5 + $0x1cc] sm:$0xf0]  ;;  %v4593_v15 = vld [vmem:[#allocation5 + $0x44] sm:$0xf] }
  0xc7   :  { %1593 = vmatpush.bf16.msra.mxu2 %v3536_v33  ;;  %v1274_v33 = vadd.f32 %v4941_v16, %v272_v21  ;;  %v3976_v40 = vor.u32 %v4643_v32, %v3975_v29  ;;  %v3815_v16 = vld [vmem:[#allocation5 + $0x80] sm:$0xf]  ;;  %v3865_v21 = vld [vmem:[#allocation5 + $0xf0] sm:$0xf0] }
  0xc8   :  { %1569 = vmatpush.bf16.msrb.mxu1 %v3248_v52  ;;  %1607 = vmatpush.bf16.msra.mxu0 %v3648_v58  ;;  %v3816_v53 = vor.u32 %v4603_v44, %v3815_v16  ;;  %v4087_v44 = vld [vmem:[#allocation5 + $0x2a0] sm:$0xf] }
  0xc9   :  { %v1287_v43 = vadd.f32 %v4943_v25, %v1274_v33  ;;  %v3799_v25 = vld [vmem:[#allocation5 + $0x60] sm:$0xf] }
  0xca   :  { %1581 = vmatpush.bf16.msra.mxu3 %v3392_v48  ;;  %v3943_v48 = vld [vmem:[#allocation5 + $0x180] sm:$0xf]  ;;  %v3800_v59 = vor.u32 %v4599_v54, %v3799_v25  ;;  %v4667_v54 = vld [vmem:[#allocation5 + $0x28c] sm:$0xf0] }
  0xcb   :  { %1594 = vmatpush.bf16.msra.mxu2 %v3520_v49  ;;  %v1325_v47 = vpop.f32.mrf.mxu0  ;;  %v4635_v49 = vld [vmem:[#allocation5 + $0x18c] sm:$0xf0]  ;;  %v1300_v50 = vadd.f32 %v4945_v31, %v1287_v43  ;;  %v3977_v43 = vld [vmem:[#allocation5 + $0x1d0] sm:$0xf0]  ;;  %v4071_v25 = vld [vmem:[#allocation5 + $0x280] sm:$0xf] }
  0xcc   :  { %1570 = vmatpush.bf16.msrb.mxu1 %v3232_v8  ;;  %1608 = vmatpush.bf16.msra.mxu0 %v3632_v13  ;;  %v1353_v52 = vpop.f32.mrf.mxu2  ;;  %v3767_v8 = vld [vmem:[#allocation5 + $0x20] sm:$0xf] }
  0xcd   :  { %v1313_v58 = vadd.f32 %v4947_v37, %v1300_v50  ;;  %v3768_v13 = vor.u32 %v4591_v9, %v3767_v8  ;;  %v3961_v52 = vld [vmem:[#allocation5 + $0x1b0] sm:$0xf0]  ;;  %v4629_v9 = vld [vmem:[#allocation5 + $0x164] sm:$0xf] }
  0xce   :  { %1582 = vmatpush.bf16.msra.mxu3 %v3376_v4 }
  0xcf   :  { %1595 = vmatpush.bf16.msra.mxu2 %v3504_v5  ;;  %1571 = vmatmul.bf16.vlgmr.msrb.gmra.mxu1 %v4889_v51  ;;  %v3832_v51 = vor.u32 %v4607_v39, %v3831_v38  ;;  %v1326_v60 = vadd.f32 %v1325_v47, %v1313_v58  ;;  %v3784_v5 = vor.u32 %v4595_v62, %v3783_v61  ;;  %v4609_v38 = vld [vmem:[#allocation5 + $0xc4] sm:$0xf]  ;;  %v3849_v39 = vld [vmem:[#allocation5 + $0xd0] sm:$0xf0] }
  0xd0   :  { %1622 = vmatpush.bf16.msra.mxu1 %v3744_v17  ;;  %1609 = vmatpush.bf16.msra.mxu0 %v3616_v7  ;;  %v3896_v17 = vor.u32 %v4623_v12, %v3895_v11  ;;  %v4645_v7 = vld [vmem:[#allocation5 + $0x1e4] sm:$0xf]  ;;  %v3852_v16 = vor.u32 %v4609_v38, %v3849_v39  ;;  %v4072_v58 = vor.u32 %v4667_v54, %v4071_v25  ;;  %v4039_v12 = vld [vmem:[#allocation5 + $0x240] sm:$0xf] }
  0xd1   :  { %v4605_v47 = vld [vmem:[#allocation5 + $0xa4] sm:$0xf] }
  0xd2   :  { %1583 = vmatpush.bf16.msra.mxu3 %v3360_v22  ;;  %v3879_v22 = vld [vmem:[#allocation5 + $0x100] sm:$0xf]  ;;  %v4585_v38 = vld [vmem:[#allocation5 + $0x4] sm:$0xf] }
  0xd3   :  { %1596 = vmatpush.bf16.msra.mxu2 %v3488_v23  ;;  %1610 = vmatmul.bf16.vlgmr.msra.gmra.mxu0 %v4919_v35  ;;  %v4631_v35 = vld [vmem:[#allocation5 + $0x16c] sm:$0xf0]  ;;  %v1327_v3 = vpop.f32.mrf.mxu0 }
  0xd4   :  { %2427 = vmatpush.bf16.msrb.mxu1 %v3992_v28  ;;  %v3928_v63 = vor.u32 %v4631_v35, %v3927_v56  ;;  %v4965_v31 = vpop.f32.mrf.mxu3  ;;  %v4619_v23 = vld [vmem:[#allocation5 + $0x10c] sm:$0xf0]  ;;  %v3817_v56 = vld [vmem:[#allocation5 + $0x90] sm:$0xf0] }
  0xd5   :  { %1584 = vmatmul.bf16.vlgmr.msra.gmra.mxu3 %v4893_v57  ;;  %v1338_v57 = vpop.f32.mrf.mxu1  ;;  %v3880_v33 = vor.u32 %v4619_v23, %v3879_v22  ;;  %v1365_v14 = vadd.f32 %v4965_v31, %v273_v1 }
  0xd6   :  { %2414 = vmatpush.bf16.msrb.mxu3 %v3864_v24  ;;  %1597 = vmatmul.bf16.vlgmr.msra.gmra.mxu2 %v4917_v30  ;;  %v3944_v30 = vor.u32 %v4635_v49, %v3943_v48  ;;  %v1339_v37 = vadd.f32 %v1338_v57, %v1326_v60  ;;  %v4120_v24 = vor.u32 %v4679_v19, %v4119_v18  ;;  %v3833_v48 = vld [vmem:[#allocation5 + $0xb0] sm:$0xf0]  ;;  %v4637_v57 = vld [vmem:[#allocation5 + $0x1a4] sm:$0xf] }
  0xd7   :  { %v3980_v49 = vor.u32 %v4641_v42, %v3977_v43  ;;  %v3964_v35 = vor.u32 %v4637_v57, %v3961_v52  ;;  %v3945_v60 = vld [vmem:[#allocation5 + $0x190] sm:$0xf0]  ;;  %v4625_v19 = vld [vmem:[#allocation5 + $0x144] sm:$0xf]  ;;  %v4651_v42 = vld [vmem:[#allocation5 + $0x20c] sm:$0xf0] }
  0xd8   :  { %2428 = vmatpush.bf16.msrb.mxu1 %v3976_v40  ;;  %v1352_v55 = vadd.f32 %v4957_v34, %v1339_v37  ;;  %2440 = vmatpush.bf16.msrb.mxu2 %v4120_v24  ;;  %v4103_v34 = vld [vmem:[#allocation5 + $0x2c0] sm:$0xf]  ;;  %v3996_v40 = vor.u32 %v4645_v7, %v3993_v26  ;;  %v4655_v7 = vld [vmem:[#allocation5 + $0x22c] sm:$0xf0]  ;;  %v3871_v43 = vld [vmem:[#allocation5 + $0xe8] sm:$0xf] }
  0xd9   :  { %v4969_v6 = vpop.f32.mrf.mxu2  ;;  %v4023_v24 = vld [vmem:[#allocation5 + $0x220] sm:$0xf] }
  0xda   :  { %2415 = vmatpush.bf16.msrb.mxu3 %v3848_v36  ;;  %v1628_v29 = vmax.f32 %v1352_v55, 0.0  ;;  %v4675_v36 = vld [vmem:[#allocation5 + $0x2cc] sm:$0xf0]  ;;  %v3785_v55 = vld [vmem:[#allocation5 + $0x50] sm:$0xf0]  ;;  %v1378_v26 = vadd.f32 %v4969_v6, %v1365_v14 }
  0xdb   :  { %v4104_v41 = vor.u32 %v4675_v36, %v4103_v34  ;;  %v3788_v23 = vor.u32 %v4593_v15, %v3785_v55  ;;  %v3897_v34 = vld [vmem:[#allocation5 + $0x130] sm:$0xf0]  ;;  %v3999_v14 = vld [vmem:[#allocation5 + $0x1e8] sm:$0xf]  ;;  %v4648_v15 = vld [vmem:[#allocation5 + $0x1f4] sm:$0xf0] }
  0xdc   :  { %2429 = vmatpush.bf16.msrb.mxu1 %v3960_v46  ;;  %v1366_v20 = vpop.f32.mrf.mxu3  ;;  %v4671_v46 = vld [vmem:[#allocation5 + $0x2ac] sm:$0xf0] }
  0xdd   :  { %v1340_v4 = vpop.f32.mrf.mxu1  ;;  %2441 = vmatpush.bf16.msrb.mxu2 %v4104_v41  ;;  %v4088_v50 = vor.u32 %v4671_v46, %v4087_v44  ;;  %v3913_v20 = vld [vmem:[#allocation5 + $0x150] sm:$0xf0]  ;;  %v4007_v41 = vld [vmem:[#allocation5 + $0x200] sm:$0xf]  ;;  %v4677_v44 = vld [vmem:[#allocation5 + $0x2e4] sm:$0xf] }
  0xde   :  { %2416 = vmatpush.bf16.msrb.mxu3 %v3832_v51  ;;  %v4972_v51 = vpack.c.bf16 %v1628_v29, %v1628_v29  ;;  %v4597_v4 = vld [vmem:[#allocation5 + $0x64] sm:$0xf]  ;;  %v3916_v31 = vor.u32 %v4625_v19, %v3913_v20  ;;  %v4008_v6 = vor.u32 %v4651_v42, %v4007_v41  ;;  %v4121_v46 = vld [vmem:[#allocation5 + $0x2f0] sm:$0xf0]  ;;  %v4604_v19 = vld [vmem:[#allocation5 + $0x94] sm:$0xf0] }
  0xdf   :  { %3748 = vmatmul.msk.bf16.vlgmr.msra.gmra.mxu1 %vm1260_vm0, %v4907_v45  ;;  %v4613_v45 = vld [vmem:[#allocation5 + $0xe4] sm:$0xf]  ;;  %v4124_v57 = vor.u32 %v4677_v44, %v4121_v46  ;;  %v4199_v42 = vld [vmem:[#allocation5 + $0x380] sm:$0xf] }
  0xe0   :  { %2430 = vmatpush.bf16.msrb.mxu1 %v3944_v30  ;;  %v3868_v32 = vor.u32 %v4613_v45, %v3865_v21  ;;  %v4601_v30 = vld [vmem:[#allocation5 + $0x84] sm:$0xf] }
  0xe1   :  { %v1379_v28 = vpop.f32.mrf.mxu2  ;;  %2442 = vmatpush.bf16.msrb.mxu2 %v4088_v50  ;;  %v3820_v62 = vor.u32 %v4601_v30, %v3817_v56  ;;  %v3881_v50 = vld [vmem:[#allocation5 + $0x110] sm:$0xf0]  ;;  %v3855_v56 = vld [vmem:[#allocation5 + $0xc8] sm:$0xf]  ;;  %v4665_v20 = vld [vmem:[#allocation5 + $0x284] sm:$0xf] }
  0xe2   :  { %2417 = vmatpush.bf16.msrb.mxu3 %v3816_v53  ;;  %v3836_v53 = vor.u32 %v4605_v47, %v3833_v48  ;;  %v3769_v28 = vld [vmem:[#allocation5 + $0x30] sm:$0xf0]  ;;  %v4616_v48 = vld [vmem:[#allocation5 + $0xf4] sm:$0xf0] }
  0xe3   :  { %v3872_v30 = vor.u32 %v4616_v48, %v3871_v43  ;;  %v4699_v43 = vld [vmem:[#allocation5 + $0x38c] sm:$0xf0]  ;;  %v3791_v48 = vld [vmem:[#allocation5 + $0x48] sm:$0xf] }
  0xe4   :  { %2431 = vmatpush.bf16.msrb.mxu1 %v3928_v63  ;;  %v4055_v63 = vld [vmem:[#allocation5 + $0x260] sm:$0xf]  ;;  %v4200_v44 = vor.u32 %v4699_v43, %v4199_v42  ;;  %v4709_v42 = vld [vmem:[#allocation5 + $0x3e4] sm:$0xf]  ;;  %v4249_v43 = vld [vmem:[#allocation5 + $0x3f0] sm:$0xf0] }
  0xe5   :  { %2443 = vmatpush.bf16.msrb.mxu2 %v4072_v58  ;;  %v4056_v8 = vor.u32 %v4663_v0, %v4055_v63  ;;  %v4673_v58 = vld [vmem:[#allocation5 + $0x2c4] sm:$0xf]  ;;  %v4711_v63 = vld [vmem:[#allocation5 + $0x3ec] sm:$0xf0] }
  0xe6   :  { %2418 = vmatpush.bf16.msrb.mxu3 %v3800_v59  ;;  %v4633_v59 = vld [vmem:[#allocation5 + $0x184] sm:$0xf] }
  0xe7   :  { %v3948_v37 = vor.u32 %v4633_v59, %v3945_v60  ;;  %v4105_v59 = vld [vmem:[#allocation5 + $0x2d0] sm:$0xf0]  ;;  %v4612_v60 = vld [vmem:[#allocation5 + $0xd4] sm:$0xf0] }
  0xe8   :  { %2432 = vmatpush.bf16.msrb.mxu1 %v3912_v10  ;;  %v3929_v10 = vld [vmem:[#allocation5 + $0x170] sm:$0xf0] }
  0xe9   :  { %2444 = vmatpush.bf16.msrb.mxu2 %v4056_v8  ;;  %v3932_v45 = vor.u32 %v4629_v9, %v3929_v10  ;;  %v4608_v9 = vld [vmem:[#allocation5 + $0xb4] sm:$0xf0] }
  0xea   :  { %2419 = vmatpush.bf16.msrb.mxu3 %v3784_v5  ;;  %v3801_v5 = vld [vmem:[#allocation5 + $0x70] sm:$0xf0] }
  0xeb   :  { %v1390_v61 = vpop.f32.mrf.mxu0  ;;  %v3804_v11 = vor.u32 %v4597_v4, %v3801_v5  ;;  %v3839_v4 = vld [vmem:[#allocation5 + $0xa8] sm:$0xf]  ;;  %v4669_v5 = vld [vmem:[#allocation5 + $0x2a4] sm:$0xf] }
  0xec   :  { %2433 = vmatpush.bf16.msrb.mxu1 %v3896_v17  ;;  %v1391_v36 = vadd.f32 %v1390_v61, %v1378_v26  ;;  %v4108_v61 = vor.u32 %v4673_v58, %v4105_v59  ;;  %v3983_v26 = vld [vmem:[#allocation5 + $0x1c8] sm:$0xf] }
  0xed   :  { %v3775_v59 = vld [vmem:[#allocation5 + $0x28] sm:$0xf] }
  0xee   :  { %2420 = vmatpush.bf16.msrb.mxu3 %v3768_v13  ;;  %v1403_v3 = vpop.f32.mrf.mxu1  ;;  %v4659_v13 = vld [vmem:[#allocation5 + $0x24c] sm:$0xf0] }
  0xef   :  { %v4040_v17 = vor.u32 %v4659_v13, %v4039_v12  ;;  %v1404_v52 = vadd.f32 %v1403_v3, %v1391_v36  ;;  %v3856_v3 = vor.u32 %v4612_v60, %v3855_v56  ;;  %v4707_v12 = vld [vmem:[#allocation5 + $0x3cc] sm:$0xf0]  ;;  %v4636_v56 = vld [vmem:[#allocation5 + $0x194] sm:$0xf0]  ;;  %v4653_v60 = vld [vmem:[#allocation5 + $0x224] sm:$0xf] }
  0xf0   :  { %2434 = vmatpush.bf16.msrb.mxu1 %v3880_v33  ;;  %v4621_v33 = vld [vmem:[#allocation5 + $0x124] sm:$0xf] }
  0xf1   :  { %2445 = vmatpush.bf16.msrb.mxu2 %v4040_v17 }
  0xf2   :  { %2421 = vmatpush.bf16.msrb.mxu3 %v3752_v27  ;;  %v4589_v27 = vld [vmem:[#allocation5 + $0x24] sm:$0xf] }
  0xf3   :  { %v1392_v21 = vpop.f32.mrf.mxu0  ;;  %v3772_v39 = vor.u32 %v4589_v27, %v3769_v28  ;;  %v4644_v27 = vld [vmem:[#allocation5 + $0x1d4] sm:$0xf0] }
  0xf4   :  { %2479 = vmatpush.bf16.msra.mxu1 %v3996_v40  ;;  %v1416_v18 = vpop.f32.mrf.mxu3  ;;  %v3753_v40 = vld [vmem:[#allocation5 + $0x10] sm:$0xf0]  ;;  %v4000_v21 = vor.u32 %v4648_v15, %v3999_v14  ;;  %v4588_v14 = vld [vmem:[#allocation5 + $0x14] sm:$0xf0]  ;;  %v4649_v15 = vld [vmem:[#allocation5 + $0x204] sm:$0xf] }
  0xf5   :  { %2422 = vmatmul.bf16.vlgmr.msrb.gmra.mxu3 %v4972_v51  ;;  %v1417_v54 = vadd.f32 %v1416_v18, %v1404_v52  ;;  %v3840_v18 = vor.u32 %v4608_v9, %v3839_v4  ;;  %v4596_v52 = vld [vmem:[#allocation5 + $0x54] sm:$0xf0]  ;;  %v4167_v4 = vld [vmem:[#allocation5 + $0x340] sm:$0xf] }
  0xf6   :  { %2466 = vmatpush.bf16.msra.mxu3 %v3868_v32  ;;  %v1405_v29 = vpop.f32.mrf.mxu1  ;;  %v4024_v32 = vor.u32 %v4655_v7, %v4023_v24  ;;  %v4703_v24 = vld [vmem:[#allocation5 + $0x3ac] sm:$0xf0]  ;;  %v3792_v58 = vor.u32 %v4596_v52, %v3791_v48  ;;  %v3841_v52 = vld [vmem:[#allocation5 + $0xb8] sm:$0xf0] }
  0xf8   :  { %2480 = vmatpush.bf16.msra.mxu1 %v3980_v49  ;;  %2446 = vmatpush.bf16.msrb.mxu2 %v4024_v32  ;;  %v4617_v49 = vld [vmem:[#allocation5 + $0x104] sm:$0xf]  ;;  %v3807_v32 = vld [vmem:[#allocation5 + $0x68] sm:$0xf] }
  0xf9   :  { %v1429_v22 = vpop.f32.mrf.mxu2 }
  0xfa   :  { %2467 = vmatpush.bf16.msra.mxu3 %v3852_v16  ;;  %v3900_v16 = vor.u32 %v4621_v33, %v3897_v34  ;;  %v1430_v1 = vadd.f32 %v1429_v22, %v1417_v54  ;;  %v4073_v22 = vld [vmem:[#allocation5 + $0x290] sm:$0xf0]  ;;  %v4661_v33 = vld [vmem:[#allocation5 + $0x264] sm:$0xf]  ;;  %v4695_v54 = vld [vmem:[#allocation5 + $0x36c] sm:$0xf0] }
  0xfb   :  { %v4076_v28 = vor.u32 %v4665_v20, %v4073_v22  ;;  %v4057_v34 = vld [vmem:[#allocation5 + $0x270] sm:$0xf0]  ;;  %v4687_v20 = vld [vmem:[#allocation5 + $0x32c] sm:$0xf0]  ;;  %v4614_v22 = vld [vmem:[#allocation5 + $0xec] sm:$0xf] }
  0xfc   :  { %2481 = vmatpush.bf16.msra.mxu1 %v3964_v35  ;;  %v1418_v47 = vpop.f32.mrf.mxu3  ;;  %2447 = vmatpush.bf16.msrb.mxu2 %v4008_v6  ;;  %v3884_v35 = vor.u32 %v4617_v49, %v3881_v50  ;;  %v4060_v41 = vor.u32 %v4661_v33, %v4057_v34  ;;  %v4640_v6 = vld [vmem:[#allocation5 + $0x1b4] sm:$0xf0]  ;;  %v4657_v49 = vld [vmem:[#allocation5 + $0x244] sm:$0xf]  ;;  %v4041_v50 = vld [vmem:[#allocation5 + $0x250] sm:$0xf0] }
  0xfe   :  { %2468 = vmatpush.bf16.msra.mxu3 %v3836_v53  ;;  %v3756_v53 = vor.u32 %v4585_v38, %v3753_v40  ;;  %v4600_v40 = vld [vmem:[#allocation5 + $0x74] sm:$0xf0] }
  0xff   :  { %v3808_v47 = vor.u32 %v4600_v40, %v3807_v32  ;;  %v4610_v32 = vld [vmem:[#allocation5 + $0xcc] sm:$0xf]  ;;  %v3857_v40 = vld [vmem:[#allocation5 + $0xd8] sm:$0xf0] }
 0x100   :  { %2482 = vmatpush.bf16.msra.mxu1 %v3948_v37  ;;  %2492 = vmatpush.bf16.msra.mxu2 %v4124_v57  ;;  %v4089_v37 = vld [vmem:[#allocation5 + $0x2b0] sm:$0xf0]  ;;  %v3860_v48 = vor.u32 %v4610_v32, %v3857_v40  ;;  %v3777_v40 = vld [vmem:[#allocation5 + $0x38] sm:$0xf0] }
 0x101   :  { %v1431_v25 = vpop.f32.mrf.mxu2  ;;  %v4092_v10 = vor.u32 %v4669_v5, %v4089_v37  ;;  %v4691_v5 = vld [vmem:[#allocation5 + $0x34c] sm:$0xf0]  ;;  %v3935_v37 = vld [vmem:[#allocation5 + $0x168] sm:$0xf] }
 0x102   :  { %2469 = vmatpush.bf16.msra.mxu3 %v3820_v62  ;;  %v4247_v62 = vld [vmem:[#allocation5 + $0x3e0] sm:$0xf]  ;;  %v4168_v9 = vor.u32 %v4691_v5, %v4167_v4  ;;  %v4642_v5 = vld [vmem:[#allocation5 + $0x1cc] sm:$0xf] }
 0x103   :  { %v4248_v0 = vor.u32 %v4711_v63, %v4247_v62  ;;  %v4183_v25 = vld [vmem:[#allocation5 + $0x360] sm:$0xf] }
 0x104   :  { %2483 = vmatpush.bf16.msra.mxu1 %v3932_v45  ;;  %2493 = vmatpush.bf16.msra.mxu2 %v4108_v61  ;;  %v1442_v8 = vpop.f32.mrf.mxu3  ;;  %v3823_v45 = vld [vmem:[#allocation5 + $0x88] sm:$0xf]  ;;  %v4025_v61 = vld [vmem:[#allocation5 + $0x230] sm:$0xf0] }
 0x105   :  { %2453 = vmatpush.bf16.msrb.mxu0 %v4248_v0  ;;  %v1443_v13 = vadd.f32 %v1442_v8, %v1430_v1  ;;  %v3824_v29 = vor.u32 %v4604_v19, %v3823_v45  ;;  %v4592_v1 = vld [vmem:[#allocation5 + $0x34] sm:$0xf0]  ;;  %v4151_v19 = vld [vmem:[#allocation5 + $0x320] sm:$0xf] }
 0x106   :  { %2470 = vmatpush.bf16.msra.mxu3 %v3804_v11  ;;  %v4231_v11 = vld [vmem:[#allocation5 + $0x3c0] sm:$0xf]  ;;  %v4632_v8 = vld [vmem:[#allocation5 + $0x174] sm:$0xf0] }
 0x107   :  { %v4232_v55 = vor.u32 %v4707_v12, %v4231_v11  ;;  %v1629_v17 = vmax.f32 %v1443_v13, 0.0  ;;  %v3759_v11 = vld [vmem:[#allocation5 + $0x8] sm:$0xf]  ;;  %v3776_v13 = vor.u32 %v4592_v1, %v3775_v59  ;;  %v3936_v45 = vor.u32 %v4632_v8, %v3935_v37  ;;  %v4701_v1 = vld [vmem:[#allocation5 + $0x3a4] sm:$0xf] }
 0x108   :  { %2484 = vmatpush.bf16.msra.mxu1 %v3916_v31  ;;  %2494 = vmatpush.bf16.msra.mxu2 %v4092_v10 }
 0x109   :  { %2454 = vmatpush.bf16.msrb.mxu0 %v4232_v55  ;;  %v4979_v7 = vpack.c.bf16 %v1629_v17, %v1629_v17  ;;  %v4009_v55 = vld [vmem:[#allocation5 + $0x210] sm:$0xf0]  ;;  %v3919_v17 = vld [vmem:[#allocation5 + $0x148] sm:$0xf] }
 0x10a   :  { %2471 = vmatpush.bf16.msra.mxu3 %v3788_v23  ;;  %v4215_v23 = vld [vmem:[#allocation5 + $0x3a0] sm:$0xf] }
 0x10b   :  { %v4216_v31 = vor.u32 %v4703_v24, %v4215_v23  ;;  %2435 = vmatmul.bf16.vlgmr.msrb.gmra.mxu1 %v4979_v7  ;;  %v4982_v38 = vpop.f32.mrf.mxu0  ;;  %v3873_v23 = vld [vmem:[#allocation5 + $0xf8] sm:$0xf0]  ;;  %v4152_v24 = vor.u32 %v4687_v20, %v4151_v19  ;;  %v4594_v19 = vld [vmem:[#allocation5 + $0x4c] sm:$0xf] }
 0x10c   :  { %2485 = vmatpush.bf16.msra.mxu1 %v3900_v16  ;;  %v1444_v36 = vpop.f32.mrf.mxu3  ;;  %2495 = vmatpush.bf16.msra.mxu2 %v4076_v28  ;;  %v3967_v16 = vld [vmem:[#allocation5 + $0x1a8] sm:$0xf]  ;;  %v4624_v28 = vld [vmem:[#allocation5 + $0x134] sm:$0xf0] }
 0x10d   :  { %2455 = vmatpush.bf16.msrb.mxu0 %v4216_v31  ;;  %v3968_v57 = vor.u32 %v4640_v6, %v3967_v16  ;;  %v4135_v36 = vld [vmem:[#allocation5 + $0x300] sm:$0xf]  ;;  %v274_v16 = vperm.slane %v4952_v2, 2 }
 0x10e   :  { %2472 = vmatpush.bf16.msra.mxu3 %v3772_v39  ;;  %v3984_v39 = vor.u32 %v4644_v27, %v3983_v26  ;;  %v4984_v46 = vpop.f32.mrf.mxu1  ;;  %v3760_v26 = vor.u32 %v4588_v14, %v3759_v11  ;;  %v3903_v27 = vld [vmem:[#allocation5 + $0x128] sm:$0xf]  ;;  %v4598_v11 = vld [vmem:[#allocation5 + $0x6c] sm:$0xf]  ;;  %v4697_v14 = vld [vmem:[#allocation5 + $0x384] sm:$0xf] }
 0x110   :  { %2486 = vmatpush.bf16.msra.mxu1 %v3884_v35  ;;  %2496 = vmatpush.bf16.msra.mxu2 %v4060_v41  ;;  %v4184_v35 = vor.u32 %v4695_v54, %v4183_v25  ;;  %v4233_v25 = vld [vmem:[#allocation5 + $0x3d0] sm:$0xf0]  ;;  %v1456_v54 = vadd.f32 %v4984_v46, %v274_v16  ;;  %v3985_v46 = vld [vmem:[#allocation5 + $0x1d8] sm:$0xf0]  ;;  %v4630_v16 = vld [vmem:[#allocation5 + $0x16c] sm:$0xf] }
 0x111   :  { %2456 = vmatpush.bf16.msrb.mxu0 %v4200_v44  ;;  %v4252_v44 = vor.u32 %v4709_v42, %v4249_v43  ;;  %v4169_v42 = vld [vmem:[#allocation5 + $0x350] sm:$0xf0] }
 0x112   :  { %2473 = vmatpush.bf16.msra.mxu3 %v3756_v53  ;;  %v4044_v53 = vor.u32 %v4657_v49, %v4041_v50  ;;  %v3887_v49 = vld [vmem:[#allocation5 + $0x108] sm:$0xf]  ;;  %v4620_v50 = vld [vmem:[#allocation5 + $0x114] sm:$0xf0] }
 0x113   :  { %v1483_v63 = vpop.f32.mrf.mxu0 }
 0x114   :  { %2531 = vmatpush.bf16.msrb.mxu1 %v4000_v21  ;;  %2497 = vmatpush.bf16.msra.mxu2 %v4044_v53  ;;  %v4628_v21 = vld [vmem:[#allocation5 + $0x154] sm:$0xf0]  ;;  %v4705_v53 = vld [vmem:[#allocation5 + $0x3c4] sm:$0xf] }
 0x115   :  { %2474 = vmatmul.bf16.vlgmr.msra.gmra.mxu3 %v4972_v51  ;;  %2457 = vmatpush.bf16.msrb.mxu0 %v4184_v35  ;;  %v3920_v31 = vor.u32 %v4628_v21, %v3919_v17  ;;  %v4236_v35 = vor.u32 %v4705_v53, %v4233_v25  ;;  %v3969_v17 = vld [vmem:[#allocation5 + $0x1b8] sm:$0xf0]  ;;  %v4685_v25 = vld [vmem:[#allocation5 + $0x324] sm:$0xf] }
 0x116   :  { %2518 = vmatpush.bf16.msrb.mxu3 %v3872_v30  ;;  %v3951_v30 = vld [vmem:[#allocation5 + $0x188] sm:$0xf]  ;;  %v1457_v12 = vpop.f32.mrf.mxu1  ;;  %v3793_v21 = vld [vmem:[#allocation5 + $0x58] sm:$0xf0] }
 0x117   :  { %v3952_v0 = vor.u32 %v4636_v56, %v3951_v30  ;;  %v4646_v30 = vld [vmem:[#allocation5 + $0x1ec] sm:$0xf]  ;;  %v4001_v56 = vld [vmem:[#allocation5 + $0x1f8] sm:$0xf0]  ;;  %v3988_v12 = vor.u32 %v4642_v5, %v3985_v46  ;;  %v4137_v5 = vld [vmem:[#allocation5 + $0x310] sm:$0xf0] }
 0x118   :  { %2532 = vmatpush.bf16.msrb.mxu1 %v3984_v39  ;;  %v4986_v62 = vpop.f32.mrf.mxu3  ;;  %v4683_v39 = vld [vmem:[#allocation5 + $0x30c] sm:$0xf0]  ;;  %v4004_v63 = vor.u32 %v4646_v30, %v4001_v56  ;;  %v3761_v53 = vld [vmem:[#allocation5 + $0x18] sm:$0xf0]  ;;  %v4626_v56 = vld [vmem:[#allocation5 + $0x14c] sm:$0xf] }
 0x119   :  { %v4988_v10 = vpop.f32.mrf.mxu2  ;;  %2458 = vmatpush.bf16.msrb.mxu0 %v4168_v9  ;;  %v4136_v41 = vor.u32 %v4683_v39, %v4135_v36  ;;  %v1469_v4 = vadd.f32 %v4986_v62, %v1456_v54  ;;  %v4153_v54 = vld [vmem:[#allocation5 + $0x330] sm:$0xf0]  ;;  %v4622_v46 = vld [vmem:[#allocation5 + $0x12c] sm:$0xf] }
 0x11a   :  { %2519 = vmatpush.bf16.msrb.mxu3 %v3856_v3  ;;  %v4028_v3 = vor.u32 %v4653_v60, %v4025_v61  ;;  %v4602_v60 = vld [vmem:[#allocation5 + $0x8c] sm:$0xf] }
 0x11b   :  { %2487 = vmatmul.bf16.vlgmr.msra.gmra.mxu1 %v4979_v7  ;;  %v4991_v34 = vpop.f32.mrf.mxu0 }
 0x11c   :  { %2533 = vmatpush.bf16.msrb.mxu1 %v3968_v57  ;;  %2498 = vmatpush.bf16.msra.mxu2 %v4028_v3  ;;  %v4606_v57 = vld [vmem:[#allocation5 + $0xac] sm:$0xf]  ;;  %v4217_v3 = vld [vmem:[#allocation5 + $0x3b0] sm:$0xf0] }
 0x11d   :  { %2459 = vmatpush.bf16.msrb.mxu0 %v4152_v24  ;;  %v3844_v59 = vor.u32 %v4606_v57, %v3841_v52  ;;  %v4220_v37 = vor.u32 %v4701_v1, %v4217_v3  ;;  %v4586_v57 = vld [vmem:[#allocation5 + $0xc] sm:$0xf] }
 0x11e   :  { %2520 = vmatpush.bf16.msrb.mxu3 %v3840_v18  ;;  %v4012_v18 = vor.u32 %v4649_v15, %v4009_v55  ;;  %v4201_v15 = vld [vmem:[#allocation5 + $0x390] sm:$0xf0]  ;;  %v1482_v55 = vadd.f32 %v4982_v38, %v1469_v4  ;;  %v4681_v4 = vld [vmem:[#allocation5 + $0x304] sm:$0xf] }
 0x11f   :  { %v4204_v62 = vor.u32 %v4697_v14, %v4201_v15  ;;  %v4618_v15 = vld [vmem:[#allocation5 + $0x10c] sm:$0xf] }
 0x120   :  { %2534 = vmatpush.bf16.msrb.mxu1 %v3952_v0  ;;  %v1470_v33 = vpop.f32.mrf.mxu3  ;;  %2499 = vmatpush.bf16.msra.mxu2 %v4012_v18  ;;  %v3825_v0 = vld [vmem:[#allocation5 + $0x98] sm:$0xf0]  ;;  %v1495_v24 = vadd.f32 %v4988_v10, %v1482_v55 }
 0x121   :  { %v1496_v6 = vpop.f32.mrf.mxu2  ;;  %2460 = vmatpush.bf16.msrb.mxu0 %v4136_v41  ;;  %v3828_v9 = vor.u32 %v4602_v60, %v3825_v0  ;;  %v4590_v33 = vld [vmem:[#allocation5 + $0x2c] sm:$0xf]  ;;  %v4689_v41 = vld [vmem:[#allocation5 + $0x344] sm:$0xf]  ;;  %v3937_v10 = vld [vmem:[#allocation5 + $0x178] sm:$0xf0] }
 0x122   :  { %2521 = vmatpush.bf16.msrb.mxu3 %v3824_v29  ;;  %v3876_v29 = vor.u32 %v4614_v22, %v3873_v23  ;;  %v4693_v22 = vld [vmem:[#allocation5 + $0x364] sm:$0xf]  ;;  %v4185_v23 = vld [vmem:[#allocation5 + $0x370] sm:$0xf0]  ;;  %v3940_v52 = vor.u32 %v4630_v16, %v3937_v10  ;;  %v4676_v0 = vld [vmem:[#allocation5 + $0x2d4] sm:$0xf0] }
 0x123   :  { %v1535_v61 = vpop.f32.mrf.mxu0  ;;  %v4188_v38 = vor.u32 %v4693_v22, %v4185_v23  ;;  %v3889_v55 = vld [vmem:[#allocation5 + $0x118] sm:$0xf0]  ;;  %v4664_v22 = vld [vmem:[#allocation5 + $0x274] sm:$0xf0]  ;;  %v4678_v10 = vld [vmem:[#allocation5 + $0x2ec] sm:$0xf] }
 0x124   :  { %2535 = vmatpush.bf16.msrb.mxu1 %v3936_v45  ;;  %v4638_v45 = vld [vmem:[#allocation5 + $0x1ac] sm:$0xf] }
 0x125   :  { %2505 = vmatpush.bf16.msra.mxu0 %v4252_v44  ;;  %v3972_v20 = vor.u32 %v4638_v45, %v3969_v17  ;;  %v4172_v44 = vor.u32 %v4689_v41, %v4169_v42  ;;  %v4079_v17 = vld [vmem:[#allocation5 + $0x288] sm:$0xf] }
 0x126   :  { %2522 = vmatpush.bf16.msrb.mxu3 %v3808_v47  ;;  %v3904_v47 = vor.u32 %v4624_v28, %v3903_v27  ;;  %v3953_v27 = vld [vmem:[#allocation5 + $0x198] sm:$0xf0] }
 0x128   :  { %2536 = vmatpush.bf16.msrb.mxu1 %v3920_v31 }
 0x129   :  { %2506 = vmatpush.bf16.msra.mxu0 %v4236_v35  ;;  %v3921_v35 = vld [vmem:[#allocation5 + $0x158] sm:$0xf0] }
 0x12a   :  { %2523 = vmatpush.bf16.msrb.mxu3 %v3792_v58  ;;  %v3888_v58 = vor.u32 %v4620_v50, %v3887_v49  ;;  %v4127_v49 = vld [vmem:[#allocation5 + $0x2e8] sm:$0xf]  ;;  %v4680_v50 = vld [vmem:[#allocation5 + $0x2f4] sm:$0xf0]  ;;  %v3924_v1 = vor.u32 %v4626_v56, %v3921_v35 }
 0x12b   :  { %v4128_v60 = vor.u32 %v4680_v50, %v4127_v49  ;;  %v4674_v50 = vld [vmem:[#allocation5 + $0x2cc] sm:$0xf] }
 0x12c   :  { %2537 = vmatpush.bf16.msrb.mxu1 %v3904_v47  ;;  %v1507_v8 = vpop.f32.mrf.mxu1 }
 0x12d   :  { %2507 = vmatpush.bf16.msra.mxu0 %v4220_v37  ;;  %v1508_v31 = vadd.f32 %v1507_v8, %v1495_v24  ;;  %v3905_v37 = vld [vmem:[#allocation5 + $0x138] sm:$0xf0] }
 0x12e   :  { %2524 = vmatpush.bf16.msrb.mxu3 %v3776_v13  ;;  %v3809_v13 = vld [vmem:[#allocation5 + $0x78] sm:$0xf0]  ;;  %v3908_v14 = vor.u32 %v4622_v46, %v3905_v37  ;;  %v4223_v37 = vld [vmem:[#allocation5 + $0x3a8] sm:$0xf] }
 0x12f   :  { %v3812_v18 = vor.u32 %v4598_v11, %v3809_v13  ;;  %v4672_v13 = vld [vmem:[#allocation5 + $0x2b4] sm:$0xf0]  ;;  %v4081_v46 = vld [vmem:[#allocation5 + $0x298] sm:$0xf0] }
 0x130   :  { %2538 = vmatpush.bf16.msrb.mxu1 %v3888_v58  ;;  %v5000_v28 = vpop.f32.mrf.mxu0 }
 0x131   :  { %2508 = vmatpush.bf16.msra.mxu0 %v4204_v62  ;;  %v4668_v62 = vld [vmem:[#allocation5 + $0x294] sm:$0xf0] }
 0x132   :  { %2525 = vmatpush.bf16.msrb.mxu3 %v3760_v26  ;;  %v4634_v26 = vld [vmem:[#allocation5 + $0x18c] sm:$0xf] }
 0x133   :  { %2539 = vmatmul.bf16.vlgmr.msrb.gmra.mxu1 %v4979_v7  ;;  %v3956_v39 = vor.u32 %v4634_v26, %v3953_v27  ;;  %v4047_v27 = vld [vmem:[#allocation5 + $0x248] sm:$0xf] }
 0x134   :  { %2583 = vmatpush.bf16.msra.mxu1 %v4004_v63  ;;  %v1509_v32 = vpop.f32.mrf.mxu1  ;;  %v4111_v63 = vld [vmem:[#allocation5 + $0x2c8] sm:$0xf] }
 0x135   :  { %2526 = vmatmul.bf16.vlgmr.msrb.gmra.mxu3 %v4972_v51  ;;  %2509 = vmatpush.bf16.msra.mxu0 %v4188_v38  ;;  %v4112_v11 = vor.u32 %v4676_v0, %v4111_v63  ;;  %v4656_v32 = vld [vmem:[#allocation5 + $0x234] sm:$0xf0]  ;;  %v4239_v63 = vld [vmem:[#allocation5 + $0x3c8] sm:$0xf] }
 0x136   :  { %2570 = vmatpush.bf16.msra.mxu3 %v3876_v29  ;;  %v3796_v29 = vor.u32 %v4594_v19, %v3793_v21  ;;  %v3892_v19 = vor.u32 %v4618_v15, %v3889_v55  ;;  %v4063_v21 = vld [vmem:[#allocation5 + $0x268] sm:$0xf]  ;;  %v4708_v0 = vld [vmem:[#allocation5 + $0x3d4] sm:$0xf0] }
 0x137   :  { %v4064_v26 = vor.u32 %v4664_v22, %v4063_v21  ;;  %v4700_v15 = vld [vmem:[#allocation5 + $0x394] sm:$0xf0]  ;;  %v4654_v22 = vld [vmem:[#allocation5 + $0x22c] sm:$0xf] }
 0x138   :  { %2584 = vmatpush.bf16.msra.mxu1 %v3988_v12  ;;  %v1520_v36 = vpop.f32.mrf.mxu3  ;;  %v1561_v58 = vpop.f32.mrf.mxu0  ;;  %v4095_v12 = vld [vmem:[#allocation5 + $0x2a8] sm:$0xf] }
 0x139   :  { %v1521_v43 = vadd.f32 %v1520_v36, %v1508_v31  ;;  %v1546_v6 = vpop.f32.mrf.mxu2  ;;  %2510 = vmatpush.bf16.msra.mxu0 %v4172_v44  ;;  %v4096_v45 = vor.u32 %v4672_v13, %v4095_v12  ;;  %v4662_v12 = vld [vmem:[#allocation5 + $0x26c] sm:$0xf]  ;;  %v4065_v13 = vld [vmem:[#allocation5 + $0x278] sm:$0xf0] }
 0x13a   :  { %2571 = vmatpush.bf16.msra.mxu3 %v3860_v48  ;;  %v3780_v48 = vor.u32 %v4590_v33, %v3777_v40  ;;  %v4068_v55 = vor.u32 %v4662_v12, %v4065_v13 }
 0x13b   :  { %v1534_v47 = vadd.f32 %v4991_v34, %v1521_v43  ;;  %v3764_v34 = vor.u32 %v4586_v57, %v3761_v53  ;;  %v4015_v43 = vld [vmem:[#allocation5 + $0x208] sm:$0xf]  ;;  %v4113_v57 = vld [vmem:[#allocation5 + $0x2d8] sm:$0xf0] }
 0x13c   :  { %2585 = vmatpush.bf16.msra.mxu1 %v3972_v20  ;;  %v4080_v20 = vor.u32 %v4668_v62, %v4079_v17  ;;  %v4116_v35 = vor.u32 %v4674_v50, %v4113_v57  ;;  %v4658_v17 = vld [vmem:[#allocation5 + $0x24c] sm:$0xf]  ;;  %v4049_v62 = vld [vmem:[#allocation5 + $0x258] sm:$0xf0]  ;;  %v5021_v57 = vld [vmem:[%s5146_s4] sm:$0xf] }
 0x13d   :  { %v1630_v30 = vmax.f32 %v1534_v47, 0.0  ;;  %v4209_v50 = vld [vmem:[#allocation5 + $0x398] sm:$0xf0] }
 0x13e   :  { %2572 = vmatpush.bf16.msra.mxu3 %v3844_v59  ;;  %v4156_v59 = vor.u32 %v4685_v25, %v4153_v54  ;;  %v4255_v25 = vld [vmem:[#allocation5 + $0x3e8] sm:$0xf]  ;;  %v4712_v54 = vld [vmem:[#allocation5 + $0x3f4] sm:$0xf0] }
 0x13f   :  { %v5003_v61 = vpack.c.bf16 %v1630_v30, %v1630_v30  ;;  %v4256_v58 = vor.u32 %v4712_v54, %v4255_v25  ;;  %v4193_v25 = vld [vmem:[#allocation5 + $0x378] sm:$0xf0] }
 0x140   :  { %2586 = vmatpush.bf16.msra.mxu1 %v3956_v39  ;;  %v1522_v3 = vpop.f32.mrf.mxu3  ;;  %2511 = vmatpush.bf16.msra.mxu0 %v4156_v59  ;;  %v4670_v59 = vld [vmem:[#allocation5 + $0x2ac] sm:$0xf] }
 0x141   :  { %2448 = vmatmul.bf16.vlgmr.msrb.gmra.mxu2 %v5003_v61  ;;  %v1548_v8 = vpop.f32.mrf.mxu2 }
 0x142   :  { %2573 = vmatpush.bf16.msra.mxu3 %v3828_v9  ;;  %v4140_v9 = vor.u32 %v4681_v4, %v4137_v5  ;;  %2544 = vmatpush.bf16.msrb.mxu2 %v4128_v60  ;;  %v4097_v60 = vld [vmem:[#allocation5 + $0x2b8] sm:$0xf0]  ;;  %v4240_v4 = vor.u32 %v4708_v0, %v4239_v63  ;;  %v4666_v5 = vld [vmem:[#allocation5 + $0x28c] sm:$0xf]  ;;  %v4704_v8 = vld [vmem:[#allocation5 + $0x3b4] sm:$0xf0] }
 0x143   :  { %v4686_v0 = vld [vmem:[#allocation5 + $0x32c] sm:$0xf] }
 0x144   :  { %2587 = vmatpush.bf16.msra.mxu1 %v3940_v52  ;;  %2512 = vmatpush.bf16.msra.mxu0 %v4140_v9  ;;  %v4084_v9 = vor.u32 %v4666_v5, %v4081_v46  ;;  %v4145_v5 = vld [vmem:[#allocation5 + $0x318] sm:$0xf0] }
 0x146   :  { %2574 = vmatpush.bf16.msra.mxu3 %v3812_v18  ;;  %2545 = vmatpush.bf16.msrb.mxu2 %v4112_v11  ;;  %v275_v18 = vperm.slane %v4952_v2, 3  ;;  %v4224_v11 = vor.u32 %v4704_v8, %v4223_v37 }
 0x148   :  { %2588 = vmatpush.bf16.msra.mxu1 %v3924_v1  ;;  %v1547_v23 = vadd.f32 %v1546_v6, %v275_v18  ;;  %v4129_v6 = vld [vmem:[#allocation5 + $0x2f8] sm:$0xf0]  ;;  %v4100_v1 = vor.u32 %v4670_v59, %v4097_v60  ;;  %v4191_v18 = vld [vmem:[#allocation5 + $0x368] sm:$0xf] }
 0x14a   :  { %2575 = vmatpush.bf16.msra.mxu3 %v3796_v29  ;;  %2546 = vmatpush.bf16.msrb.mxu2 %v4096_v45  ;;  %v1560_v38 = vadd.f32 %v5000_v28, %v1547_v23  ;;  %v4031_v29 = vld [vmem:[#allocation5 + $0x228] sm:$0xf]  ;;  %v4033_v23 = vld [vmem:[#allocation5 + $0x238] sm:$0xf0] }
 0x14b   :  { %v4032_v42 = vor.u32 %v4656_v32, %v4031_v29  ;;  %v4159_v29 = vld [vmem:[#allocation5 + $0x328] sm:$0xf]  ;;  %v4688_v32 = vld [vmem:[#allocation5 + $0x334] sm:$0xf0] }
 0x14c   :  { %2589 = vmatpush.bf16.msra.mxu1 %v3908_v14  ;;  %v1572_v24 = vpop.f32.mrf.mxu1  ;;  %v4207_v14 = vld [vmem:[#allocation5 + $0x388] sm:$0xf] }
 0x14d   :  { %v1573_v33 = vadd.f32 %v1572_v24, %v1560_v38  ;;  %v4208_v45 = vor.u32 %v4700_v15, %v4207_v14  ;;  %v4175_v24 = vld [vmem:[#allocation5 + $0x348] sm:$0xf]  ;;  %v4720_v14 = vld [vmem:[%s5147_s5 + $0x38] sm:$0xff] }
 0x14e   :  { %2576 = vmatpush.bf16.msra.mxu3 %v3780_v48  ;;  %2547 = vmatpush.bf16.msrb.mxu2 %v4080_v20  ;;  %v4132_v48 = vor.u32 %v4678_v10, %v4129_v6  ;;  %v4052_v20 = vor.u32 %v4658_v17, %v4049_v62  ;;  %v4706_v10 = vld [vmem:[#allocation5 + $0x3cc] sm:$0xf]  ;;  %v4241_v6 = vld [vmem:[#allocation5 + $0x3d8] sm:$0xf0] }
 0x150   :  { %2590 = vmatpush.bf16.msra.mxu1 %v3892_v19  ;;  %v1611_v2 = vpop.f32.mrf.mxu0  ;;  %v4696_v19 = vld [vmem:[#allocation5 + $0x374] sm:$0xf0] }
 0x151   :  { %2500 = vmatmul.bf16.vlgmr.msra.gmra.mxu2 %v5003_v61  ;;  %v4192_v21 = vor.u32 %v4696_v19, %v4191_v18  ;;  %v4718_v18 = vld [vmem:[%s5147_s5 + $0x28] sm:$0xff] }
 0x152   :  { %2577 = vmatpush.bf16.msra.mxu3 %v3764_v34  ;;  %2548 = vmatpush.bf16.msrb.mxu2 %v4064_v26  ;;  %v4692_v26 = vld [vmem:[#allocation5 + $0x354] sm:$0xf0] }
 0x153   :  { %2591 = vmatmul.bf16.vlgmr.msra.gmra.mxu1 %v4979_v7  ;;  %v4652_v7 = vld [vmem:[#allocation5 + $0x214] sm:$0xf0]  ;;  %v4176_v38 = vor.u32 %v4692_v26, %v4175_v24  ;;  %v4715_v26 = vld [vmem:[%s5147_s5 + $0x10] sm:$0xff] }
 0x154   :  { %v1574_v36 = vpop.f32.mrf.mxu1  ;;  %v4016_v47 = vor.u32 %v4652_v7, %v4015_v43  ;;  %v4257_v43 = vld [vmem:[#allocation5 + $0x3f8] sm:$0xf0] }
 0x155   :  { %2578 = vmatmul.bf16.vlgmr.msra.gmra.mxu3 %v4972_v51  ;;  %v4660_v51 = vld [vmem:[#allocation5 + $0x254] sm:$0xf0]  ;;  %v4160_v36 = vor.u32 %v4688_v32, %v4159_v29  ;;  %v1769_v32 = vperm.slane %v5021_v57, 3 }
 0x156   :  { %v4048_v31 = vor.u32 %v4660_v51, %v4047_v27  ;;  %v4036_v51 = vor.u32 %v4654_v22, %v4033_v23  ;;  %2890 = vmatpush.bf16.msrb.mxu3 %v4720_v14  ;;  %v4716_v22 = vld [vmem:[%s5147_s5 + $0x18] sm:$0xff] }
 0x157   :  { %v4728_v23 = vld [vmem:[%s5147_s5 + $0x78] sm:$0xff] }
 0x158   :  { %v1585_v39 = vpop.f32.mrf.mxu3  ;;  %2549 = vmatpush.bf16.msrb.mxu2 %v4048_v31  ;;  %v1613_v28 = vpop.f32.mrf.mxu0  ;;  %v4017_v31 = vld [vmem:[#allocation5 + $0x218] sm:$0xf0]  ;;  %2903 = vmatpush.bf16.msrb.mxu1 %v4728_v23 }
 0x159   :  { %v1586_v40 = vadd.f32 %v1585_v39, %v1573_v33  ;;  %v1598_v41 = vpop.f32.mrf.mxu2  ;;  %v4143_v39 = vld [vmem:[#allocation5 + $0x308] sm:$0xf]  ;;  %v4244_v28 = vor.u32 %v4706_v10, %v4241_v6 }
 0x15a   :  { %v4722_v10 = vld [vmem:[%s5147_s5 + $0x48] sm:$0xff] }
 0x15b   :  { %v1599_v16 = vadd.f32 %v1598_v41, %v1586_v40  ;;  %v4684_v40 = vld [vmem:[#allocation5 + $0x314] sm:$0xf0]  ;;  %v4734_v6 = vld [vmem:[%s5147_s5 + $0xa8] sm:$0xff] }
 0x15c   :  { %2550 = vmatpush.bf16.msrb.mxu2 %v4032_v42  ;;  %v1624_v49 = vpop.f32.mrf.mxu1  ;;  %v4710_v42 = vld [vmem:[#allocation5 + $0x3ec] sm:$0xf]  ;;  %v4144_v7 = vor.u32 %v4684_v40, %v4143_v39 }
 0x15d   :  { %v1612_v44 = vadd.f32 %v1611_v2, %v1599_v16  ;;  %v4650_v2 = vld [vmem:[#allocation5 + $0x20c] sm:$0xf]  ;;  %v4260_v16 = vor.u32 %v4710_v42, %v4257_v43  ;;  %v4735_v42 = vld [vmem:[%s5147_s5 + $0xb0] sm:$0xff] }
 0x15e   :  { %v4020_v33 = vor.u32 %v4650_v2, %v4017_v31  ;;  %v4713_v2 = vld [vmem:[%s5147_s5] sm:$0xff] }
 0x15f   :  { %v1625_v52 = vadd.f32 %v1624_v49, %v1612_v44  ;;  %v4702_v44 = vld [vmem:[#allocation5 + $0x3ac] sm:$0xf]  ;;  %v4725_v31 = vld [vmem:[%s5147_s5 + $0x60] sm:$0xff] }
 0x160   :  { %v1587_v53 = vpop.f32.mrf.mxu3  ;;  %2551 = vmatpush.bf16.msrb.mxu2 %v4016_v47  ;;  %v4225_v47 = vld [vmem:[#allocation5 + $0x3b8] sm:$0xf0]  ;;  %v4698_v49 = vld [vmem:[#allocation5 + $0x38c] sm:$0xf] }
 0x161   :  { %v1600_v30 = vpop.f32.mrf.mxu2  ;;  %v1631_v56 = vmax.f32 %v1625_v52, 0.0  ;;  %v1766_v52 = vperm.slane %v5021_v57, 0  ;;  %v4694_v53 = vld [vmem:[#allocation5 + $0x36c] sm:$0xf] }
 0x162   :  { %v4196_v54 = vor.u32 %v4694_v53, %v4193_v25  ;;  %v4730_v53 = vld [vmem:[%s5147_s5 + $0x88] sm:$0xff] }
 0x163   :  { %v5011_v34 = vpack.c.bf16 %v1631_v56, %v1631_v56  ;;  %2552 = vmatmul.bf16.vlgmr.msrb.gmra.mxu2 %v5003_v61  ;;  %v4690_v56 = vld [vmem:[#allocation5 + $0x34c] sm:$0xf] }
 0x164   :  { %2596 = vmatpush.bf16.msra.mxu2 %v4132_v48  ;;  %v1626_v3 = vpop.f32.mrf.mxu1  ;;  %v4228_v48 = vor.u32 %v4702_v44, %v4225_v47  ;;  %v4721_v44 = vld [vmem:[%s5147_s5 + $0x40] sm:$0xff] }
 0x165   :  { %2461 = vmatmul.bf16.vlgmr.msrb.gmra.mxu0 %v5011_v34  ;;  %v4733_v47 = vld [vmem:[%s5147_s5 + $0xa0] sm:$0xff] }
 0x166   :  { %2557 = vmatpush.bf16.msrb.mxu0 %v4256_v58 }
 0x168   :  { %2597 = vmatpush.bf16.msra.mxu2 %v4116_v35  ;;  %v4177_v35 = vld [vmem:[#allocation5 + $0x358] sm:$0xf0] }
 0x169   :  { %v4180_v63 = vor.u32 %v4690_v56, %v4177_v35  ;;  %v4729_v56 = vld [vmem:[%s5147_s5 + $0x80] sm:$0xff]  ;;  %v4744_v35 = vld [vmem:[%s5147_s5 + $0xf8] sm:$0xff] }
 0x16a   :  { %2558 = vmatpush.bf16.msrb.mxu0 %v4240_v4  ;;  %v4682_v4 = vld [vmem:[#allocation5 + $0x30c] sm:$0xf] }
 0x16b   :  { %v4148_v8 = vor.u32 %v4682_v4, %v4145_v5 }
 0x16c   :  { %2598 = vmatpush.bf16.msra.mxu2 %v4100_v1  ;;  %v4161_v1 = vld [vmem:[#allocation5 + $0x338] sm:$0xf0] }
 0x16d   :  { %v4164_v3 = vor.u32 %v4686_v0, %v4161_v1  ;;  %v4742_v0 = vld [vmem:[%s5147_s5 + $0xe8] sm:$0xff] }
 0x16e   :  { %2559 = vmatpush.bf16.msrb.mxu0 %v4224_v11 }
 0x170   :  { %2599 = vmatpush.bf16.msra.mxu2 %v4084_v9  ;;  %v1767_v9 = vperm.slane %v5021_v57, 1 }
 0x172   :  { %2560 = vmatpush.bf16.msrb.mxu0 %v4208_v45  ;;  %v4719_v45 = vld [vmem:[%s5147_s5 + $0x30] sm:$0xff] }
 0x173   :  { %2891 = vmatpush.bf16.msrb.mxu3 %v4719_v45 }
 0x174   :  { %2600 = vmatpush.bf16.msra.mxu2 %v4068_v55  ;;  %v1768_v55 = vperm.slane %v5021_v57, 2  ;;  %v4731_v57 = vld [vmem:[%s5147_s5 + $0x90] sm:$0xff] }
 0x175   :  { %2513 = vmatmul.bf16.vlgmr.msra.gmra.mxu0 %v5011_v34 }
 0x176   :  { %2561 = vmatpush.bf16.msrb.mxu0 %v4192_v21 }
 0x177   :  { %2892 = vmatpush.bf16.msrb.mxu3 %v4718_v18 }
 0x178   :  { %v2423_v27 = vpop.f32.mrf.mxu3  ;;  %2601 = vmatpush.bf16.msra.mxu2 %v4052_v20  ;;  %v4717_v20 = vld [vmem:[%s5147_s5 + $0x20] sm:$0xff] }
 0x179   :  { %v2424_v30 = vadd.f32 %v2423_v27, %v1766_v52  ;;  %v4727_v27 = vld [vmem:[%s5147_s5 + $0x70] sm:$0xff] }
 0x17a   :  { %2562 = vmatpush.bf16.msrb.mxu0 %v4176_v38  ;;  %2904 = vmatpush.bf16.msrb.mxu1 %v4727_v27  ;;  %v4726_v38 = vld [vmem:[%s5147_s5 + $0x68] sm:$0xff] }
 0x17b   :  { %2893 = vmatpush.bf16.msrb.mxu3 %v4717_v20 }
 0x17c   :  { %2602 = vmatpush.bf16.msra.mxu2 %v4036_v51  ;;  %v4714_v51 = vld [vmem:[%s5147_s5 + $0x8] sm:$0xff] }
 0x17e   :  { %2563 = vmatpush.bf16.msrb.mxu0 %v4160_v36  ;;  %2905 = vmatpush.bf16.msrb.mxu1 %v4726_v38  ;;  %v4736_v36 = vld [vmem:[%s5147_s5 + $0xb8] sm:$0xff] }
 0x17f   :  { %2894 = vmatpush.bf16.msrb.mxu3 %v4716_v22 }
 0x180   :  { %v2425_v41 = vpop.f32.mrf.mxu3  ;;  %2603 = vmatpush.bf16.msra.mxu2 %v4020_v33  ;;  %v4724_v33 = vld [vmem:[%s5147_s5 + $0x58] sm:$0xff] }
 0x181   :  { %v4723_v41 = vld [vmem:[%s5147_s5 + $0x50] sm:$0xff] }
 0x182   :  { %2564 = vmatpush.bf16.msrb.mxu0 %v4144_v7  ;;  %2906 = vmatpush.bf16.msrb.mxu1 %v4725_v31 }
 0x183   :  { %2604 = vmatmul.bf16.vlgmr.msra.gmra.mxu2 %v5003_v61  ;;  %v4212_v61 = vor.u32 %v4698_v49, %v4209_v50  ;;  %2895 = vmatpush.bf16.msrb.mxu3 %v4715_v26  ;;  %v4732_v50 = vld [vmem:[%s5147_s5 + $0x98] sm:$0xff] }
 0x184   :  { %2916 = vmatpush.bf16.msrb.mxu2 %v4736_v36 }
 0x185   :  { %2565 = vmatmul.bf16.vlgmr.msrb.gmra.mxu0 %v5011_v34 }
 0x186   :  { %2609 = vmatpush.bf16.msra.mxu0 %v4260_v16  ;;  %2907 = vmatpush.bf16.msrb.mxu1 %v4724_v33 }
 0x187   :  { %2896 = vmatpush.bf16.msrb.mxu3 %v4714_v51 }
 0x188   :  { %v2436_v58 = vpop.f32.mrf.mxu1  ;;  %2917 = vmatpush.bf16.msrb.mxu2 %v4735_v42 }
 0x189   :  { %v5024_v60 = vadd.f32 %v2436_v58, %v2424_v30 }
 0x18a   :  { %2610 = vmatpush.bf16.msra.mxu0 %v4244_v28  ;;  %2908 = vmatpush.bf16.msrb.mxu1 %v4723_v41 }
 0x18b   :  { %2897 = vmatpush.bf16.msrb.mxu3 %v4713_v2 }
 0x18c   :  { %2918 = vmatpush.bf16.msrb.mxu2 %v4734_v6 }
 0x18e   :  { %2611 = vmatpush.bf16.msra.mxu0 %v4228_v48  ;;  %2909 = vmatpush.bf16.msrb.mxu1 %v4722_v10 }
 0x190   :  { %v2438_v46 = vpop.f32.mrf.mxu1  ;;  %2919 = vmatpush.bf16.msrb.mxu2 %v4733_v47 }
 0x192   :  { %2612 = vmatpush.bf16.msra.mxu0 %v4212_v61  ;;  %2910 = vmatpush.bf16.msrb.mxu1 %v4721_v44 }
 0x194   :  { %2920 = vmatpush.bf16.msrb.mxu2 %v4732_v50 }
 0x196   :  { %2613 = vmatpush.bf16.msra.mxu0 %v4196_v54 }
 0x198   :  { %v2475_v59 = vpop.f32.mrf.mxu3  ;;  %v2488_v12 = vpop.f32.mrf.mxu1  ;;  %2921 = vmatpush.bf16.msrb.mxu2 %v4731_v57 }
 0x199   :  { %v2476_v11 = vadd.f32 %v2475_v59, %v1767_v9 }
 0x19a   :  { %2614 = vmatpush.bf16.msra.mxu0 %v4180_v63 }
 0x19b   :  { %v5027_v13 = vadd.f32 %v2488_v12, %v2476_v11  ;;  %v4739_v11 = vld [vmem:[%s5147_s5 + $0xd0] sm:$0xff] }
 0x19c   :  { %2922 = vmatpush.bf16.msrb.mxu2 %v4730_v53 }
 0x19e   :  { %2615 = vmatpush.bf16.msra.mxu0 %v4164_v3  ;;  %v4741_v3 = vld [vmem:[%s5147_s5 + $0xe0] sm:$0xff] }
 0x1a0   :  { %v2477_v37 = vpop.f32.mrf.mxu3  ;;  %v2490_v15 = vpop.f32.mrf.mxu1  ;;  %2923 = vmatpush.bf16.msrb.mxu2 %v4729_v56 }
 0x1a1   :  { %v4740_v37 = vld [vmem:[%s5147_s5 + $0xd8] sm:$0xff]  ;;  %v4737_v15 = vld [vmem:[%s5147_s5 + $0xc0] sm:$0xff] }
 0x1a2   :  { %2616 = vmatpush.bf16.msra.mxu0 %v4148_v8 }
 0x1a5   :  { %2617 = vmatmul.bf16.vlgmr.msra.gmra.mxu0 %v5011_v34 }
 0x1a6   :  { %2929 = vmatpush.bf16.msrb.mxu0 %v4744_v35 }
 0x1b0   :  { %v2540_v34 = vpop.f32.mrf.mxu1 }
 0x1b8   :  { %v2527_v17 = vpop.f32.mrf.mxu3  ;;  %v2542_v24 = vpop.f32.mrf.mxu1 }
 0x1b9   :  { %v2528_v62 = vadd.f32 %v2527_v17, %v1768_v55 }
 0x1bb   :  { %v5040_v19 = vadd.f32 %v2540_v34, %v2528_v62 }
 0x1c0   :  { %v2529_v21 = vpop.f32.mrf.mxu3 }
 0x1c4   :  { %v2449_v29 = vpop.f32.mrf.mxu2 }
 0x1c5   :  { %v2450_v52 = vadd.f32 %v2449_v29, %v5024_v60  ;;  %v4743_v60 = vld [vmem:[%s5147_s5 + $0xf0] sm:$0xff] }
 0x1c6   :  { %2930 = vmatpush.bf16.msrb.mxu0 %v4743_v60 }
 0x1ca   :  { %2931 = vmatpush.bf16.msrb.mxu0 %v4742_v0 }
 0x1cc   :  { %v2451_v7 = vpop.f32.mrf.mxu2 }
 0x1ce   :  { %2932 = vmatpush.bf16.msrb.mxu0 %v4741_v3 }
 0x1d0   :  { %v2592_v43 = vpop.f32.mrf.mxu1 }
 0x1d2   :  { %2933 = vmatpush.bf16.msrb.mxu0 %v4740_v37 }
 0x1d4   :  { %v2501_v49 = vpop.f32.mrf.mxu2 }
 0x1d5   :  { %v2502_v4 = vadd.f32 %v2501_v49, %v5027_v13  ;;  %v4738_v13 = vld [vmem:[%s5147_s5 + $0xc8] sm:$0xff] }
 0x1d6   :  { %2934 = vmatpush.bf16.msrb.mxu0 %v4739_v11 }
 0x1d8   :  { %v2579_v39 = vpop.f32.mrf.mxu3  ;;  %v2594_v48 = vpop.f32.mrf.mxu1 }
 0x1d9   :  { %v2580_v40 = vadd.f32 %v2579_v39, %v1769_v32  ;;  %v4750_v32 = vld [vmem:[%s5148_s6] ss:$0 sm:$0xff] }
 0x1da   :  { %2935 = vmatpush.bf16.msrb.mxu0 %v4738_v13 }
 0x1db   :  { %v5082_v16 = vadd.f32 %v2592_v43, %v2580_v40 }
 0x1dc   :  { %v2503_v61 = vpop.f32.mrf.mxu2 }
 0x1de   :  { %2936 = vmatpush.bf16.msrb.mxu0 %v4737_v15 }
 0x1e0   :  { %v2581_v28 = vpop.f32.mrf.mxu3 }
 0x1e2   :  { %v2462_v25 = vpop.f32.mrf.mxu0 }
 0x1e3   :  { %v2463_v54 = vadd.f32 %v2462_v25, %v2450_v52 }
 0x1e5   :  { %v2622_v30 = vmax.f32 %v2463_v54, 0.0 }
 0x1e6   :  { %v2553_v58 = vpop.f32.mrf.mxu2 }
 0x1e7   :  { %v2626_v59 = vpack.c.bf16 %v2622_v30, %v2622_v30  ;;  %v2554_v14 = vadd.f32 %v2553_v58, %v5040_v19 }
 0x1e9   :  { %2898 = vmatmul.bf16.vlgmr.msrb.gmra.mxu3 %v2626_v59 }
 0x1ea   :  { %v2464_v63 = vpop.f32.mrf.mxu0 }
 0x1ee   :  { %v2555_v1 = vpop.f32.mrf.mxu2 }
 0x1f2   :  { %v2514_v5 = vpop.f32.mrf.mxu0 }
 0x1f3   :  { %v2515_v46 = vadd.f32 %v2514_v5, %v2502_v4 }
 0x1f5   :  { %v2623_v8 = vmax.f32 %v2515_v46, 0.0 }
 0x1f7   :  { %v2627_v9 = vpack.c.bf16 %v2623_v8, %v2623_v8 }
 0x1f9   :  { %2911 = vmatmul.bf16.vlgmr.msrb.gmra.mxu1 %v2627_v9 }
 0x1fa   :  { %v2516_v12 = vpop.f32.mrf.mxu0 }
 0x202   :  { %v2566_v55 = vpop.f32.mrf.mxu0 }
 0x203   :  { %v2567_v45 = vadd.f32 %v2566_v55, %v2554_v14 }
 0x205   :  { %v2624_v62 = vmax.f32 %v2567_v45, 0.0 }
 0x206   :  { %v2605_v17 = vpop.f32.mrf.mxu2 }
 0x207   :  { %v2628_v18 = vpack.c.bf16 %v2624_v62, %v2624_v62  ;;  %v2606_v21 = vadd.f32 %v2605_v17, %v5082_v16 }
 0x209   :  { %2924 = vmatmul.bf16.vlgmr.msrb.gmra.mxu2 %v2628_v18 }
 0x20a   :  { %v2568_v34 = vpop.f32.mrf.mxu0 }
 0x20e   :  { %v2607_v20 = vpop.f32.mrf.mxu2 }
 0x222   :  { %v2618_v22 = vpop.f32.mrf.mxu0 }
 0x223   :  { %v2619_v23 = vadd.f32 %v2618_v22, %v2606_v21 }
 0x225   :  { %v2625_v24 = vmax.f32 %v2619_v23, 0.0 }
 0x227   :  { %v2629_v26 = vpack.c.bf16 %v2625_v24, %v2625_v24 }
 0x229   :  { %2937 = vmatmul.bf16.vlgmr.msrb.gmra.mxu0 %v2629_v26 }
 0x22a   :  { %v2620_v19 = vpop.f32.mrf.mxu0 }
 0x26c   :  { %v2899_v27 = vpop.f32.mrf.mxu3 }
 0x26d   :  { %v2900_v33 = vadd.f32 %v4750_v32, %v2899_v27 }
 0x274   :  { %v2901_v51 = vpop.f32.mrf.mxu3 }
 0x276   :  { %v2912_v38 = vpop.f32.mrf.mxu1 }
 0x277   :  { %v2913_v36 = vadd.f32 %v2912_v38, %v2900_v33 }
 0x27e   :  { %v2914_v2 = vpop.f32.mrf.mxu1 }
 0x28c   :  { %v2925_v31 = vpop.f32.mrf.mxu2 }
 0x28d   :  { %v2926_v39 = vadd.f32 %v2925_v31, %v2913_v36 }
 0x294   :  { %v2927_v29 = vpop.f32.mrf.mxu2 }
 0x2a6   :  { %v2938_v40 = vpop.f32.mrf.mxu0 }
 0x2a7   :  { %v2939_v41 = vadd.f32 %v2938_v40, %v2926_v39 }
 0x2a9   :  { %2942 = vst [vmem:[#allocation7] sm:$0xff] %v2939_v41 }
 0x2aa   :  { %2953 = dma.vmem_to_hbm [thread:$0]  %s2949_s1, 128, %s2951_s14, [#allocation4]  }
 0x2ae   :  { %v2940_v42 = vpop.f32.mrf.mxu0 }
 0x2af   :  { %4827 = dma.done.wait [#allocation4], 128  }
 0x2b0   :  { %4828 = vsyncadd [#allocation4], 4294967168 }
 0x2b1   :  { %2958 = vsyncpa [#allocation3], 1 }
 0x2b2   :  { %2959 = vsyncpa [#allocation6], 1 }
 0x2b3   :  { %2960 = vsyncpa [#allocation4], 1 }

</bundles_post_ra>
